<compile_context>
chip_gen: v7x
topology: tpu7x:2x2x1
jax: 0.10.0
libtpu: 0.0.40
codegen_flags: <defaults>
</compile_context>

<pallas_src>
import functools

import jax
import jax.numpy as jnp
from jax import lax
from jax.experimental import pallas as pl
from jax.experimental.pallas import tpu as pltpu


# ----------------------------- Pallas kernel --------------------------------
def _bwext_kernel(x_ref, wp_ref, h0_ref, y_ref, hout_ref, gi_s, hs_s, *, K, H, T, B):
    """Conv1d(stride K, tanh) encoder -> GRU (T steps) -> ConvTranspose1d(stride K).

    x_ref   : (T*B, K)  f32  frame-major rows (row = t*B + b)
    wp_ref  : (3H+K+4, LP) f32  packed params, lane dim padded to LP >= 128
    h0_ref  : (B, H)    f32  initial hidden state
    y_ref   : (T*B, K)  f32  decoded frames (frame-major)
    hout_ref: (B, H)    f32  final hidden state (aliases h0_ref's buffer)
    gi_s    : (T*B, LP) f32  scratch: hoisted GRU input-gate pre-activations
    hs_s    : (T*B, H)  f32  scratch: per-step hidden states for batched decode
    """
    f32, bf16 = jnp.float32, jnp.bfloat16
    TB = T * B
    LP = wp_ref.shape[1]

    # ---- unpack packed params (static row offsets; 128-lane aligned) ----
    r = 0
    w_ih = wp_ref[r:r + H, :].astype(bf16); r += H          # (H, LP) lanes 0:3H = r|z|n
    w_hh = wp_ref[r:r + H, :].astype(bf16); r += H          # (H, LP) lanes 0:3H = r|z|n
    wc = wp_ref[r:r + K, 0:H].astype(bf16); r += K          # (K, H)  Conv1d, stride == K
    wt = wp_ref[r:r + H, 0:K].astype(bf16); r += H          # (H, K)  ConvT1d, stride == K
    b_ih = wp_ref[r:r + 1, :]; r += 1                       # (1, LP)
    b_hh = wp_ref[r:r + 1, :]; r += 1                       # (1, LP)
    bc = wp_ref[r:r + 1, 0:H]; r += 1                       # (1, H)
    bt = wp_ref[r:r + 1, 0:K]; r += 1                       # (1, K)

    # ---- hoisted bias broadcasts (outside all loops) ----
    bc_b = jnp.broadcast_to(bc, (TB, H))
    bih_b = jnp.broadcast_to(b_ih, (TB, LP))
    bhh_b = jnp.broadcast_to(b_hh, (B, LP))
    bt_b = jnp.broadcast_to(bt, (TB, K))

    # ---- batched encoder + GRU input projection: 2 MXU dots + 1 tanh ----
    x = x_ref[...].astype(bf16)                                             # (TB, K)
    e = jnp.tanh(jnp.dot(x, wc, preferred_element_type=f32) + bc_b)         # (TB, H)
    gi_s[...] = jnp.dot(e.astype(bf16), w_ih,
                        preferred_element_type=f32) + bih_b                 # (TB, LP)

    # ---- serial GRU recurrence: one fused (H,3H) dot per step (torch order r,z,n) ----
    h = h0_ref[...]                                                         # (B, H) f32
    for t in range(T):                                                      # fully unrolled
        gi = gi_s[t * B:(t + 1) * B, :]                                     # (B, LP)
        gh = jnp.dot(h.astype(bf16), w_hh, preferred_element_type=f32) + bhh_b
        rg = jax.nn.sigmoid(gi[:, 0:H] + gh[:, 0:H])
        zg = jax.nn.sigmoid(gi[:, H:2 * H] + gh[:, H:2 * H])
        ng = jnp.tanh(gi[:, 2 * H:3 * H] + rg * gh[:, 2 * H:3 * H])
        h = (1.0 - zg) * ng + zg * h
        hs_s[t * B:(t + 1) * B, :] = h                                      # off serial path

    hout_ref[...] = h

    # ---- batched ConvTranspose1d decoder: 1 dot, 1 dense store ----
    y_ref[...] = jnp.dot(hs_s[...].astype(bf16), wt,
                         preferred_element_type=f32) + bt_b                 # (TB, K)


# ----------------------------- host-side wrapper ------------------------------
def _pack_params(wc, bc, w_ih, b_ih, w_hh, b_hh, wt, bt, K, H, LP):
    """Pack all weights/biases into one (3H+K+4, LP) f32 array (one DMA, 128-lane aligned)."""
    rows = 3 * H + K + 4
    P = jnp.zeros((rows, LP), jnp.float32)
    r = 0
    P = P.at[r:r + H, 0:3 * H].set(w_ih); r += H
    P = P.at[r:r + H, 0:3 * H].set(w_hh); r += H
    P = P.at[r:r + K, 0:H].set(wc); r += K
    P = P.at[r:r + H, 0:K].set(wt); r += H
    P = P.at[r, 0:3 * H].set(b_ih[0]); r += 1
    P = P.at[r, 0:3 * H].set(b_hh[0]); r += 1
    P = P.at[r, 0:H].set(bc[0]); r += 1
    P = P.at[r, 0:K].set(bt[0]); r += 1
    return P


def _run_impl(x0, packed, h_init, *, K, H, T):
    """x0: (B, 1, F) audio. Returns (out (B,1,F), h_out (B,H))."""
    B = x0.shape[0]
    F = T * K
    TB = T * B
    LP = packed.shape[1]
    # Frame-major (T*B, K): row = t*B + b, so per-step rows are contiguous in-kernel.
    # This tiny (<=KB) transpose is fused/free under jit.
    x_tb = x0.reshape(B, T, K).transpose(1, 0, 2).reshape(TB, K).astype(jnp.float32)

    vmem = pl.BlockSpec(memory_space=pltpu.MemorySpace.VMEM)
    kernel = functools.partial(_bwext_kernel, K=K, H=H, T=T, B=B)
    flops = 2 * (TB * K * H + TB * H * 3 * H + TB * H * 3 * H + TB * H * K)
    y_tb, h_out = pl.pallas_call(
        kernel,
        out_shape=(
            jax.ShapeDtypeStruct((TB, K), jnp.float32),
            jax.ShapeDtypeStruct((B, H), jnp.float32),
        ),
        in_specs=[vmem, vmem, vmem],
        out_specs=(vmem, vmem),
        scratch_shapes=[
            pltpu.VMEM((TB, LP), jnp.float32),   # hoisted gate inputs
            pltpu.VMEM((TB, H), jnp.float32),    # per-step hidden states
        ],
        input_output_aliases={2: 1},             # hidden state in/out share a buffer
        cost_estimate=pl.CostEstimate(
            flops=flops,
            transcendentals=4 * TB * H,
            bytes_accessed=4 * (2 * TB * K + packed.size + 2 * B * H),
        ),
    )(x_tb, packed, h_init)

    out = y_tb.reshape(T, B, K).transpose(1, 0, 2).reshape(B, 1, F)
    return out, h_out


_run = jax.jit(_run_impl, static_argnames=("K", "H", "T"))


class BWExtender:
    """JAX/Pallas port of the PyTorch BWExtender wrapper.

    __call__(x) where x = (audio [B,1,frame_size], reset_flag):
      - if the flag is truthy -> reset carried hidden state (use learned h0)
      - run encoder->GRU->decoder, stash new hidden state, return output.
    """

    # TODO(synk): encoder_27_Tconv.Encoder source is unavailable; the
    # Conv1d(+tanh) -> GRU(learn_h0) -> ConvTranspose1d structure is assumed and
    # overlap_len is carried but unused (real module may do overlap-add).
    def __init__(self, frame_size, overlap_len, kernel_size, hidden_size=32, seed=0):
        assert frame_size % kernel_size == 0
        self.frame_size = frame_size
        self.overlap_len = overlap_len      # kept for interface parity (unused)
        self.kernel_size = kernel_size
        self.hidden_size = hidden_size
        self.hidden_01 = None               # carried GRU state, like the torch module

        K, H = kernel_size, hidden_size
        self.lane_pad = max(128, ((3 * H + 127) // 128) * 128)
        key = jax.random.PRNGKey(seed)
        ks = jax.random.split(key, 9)
        s = 0.1
        wc = s * jax.random.normal(ks[0], (K, H), jnp.float32)        # Conv1d
        bc = s * jax.random.normal(ks[1], (1, H), jnp.float32)
        w_ih = s * jax.random.normal(ks[2], (H, 3 * H), jnp.float32)  # GRU (r,z,n)
        b_ih = s * jax.random.normal(ks[3], (1, 3 * H), jnp.float32)
        w_hh = s * jax.random.normal(ks[4], (H, 3 * H), jnp.float32)
        b_hh = s * jax.random.normal(ks[5], (1, 3 * H), jnp.float32)
        wt = s * jax.random.normal(ks[6], (H, K), jnp.float32)        # ConvTranspose1d
        bt = s * jax.random.normal(ks[7], (1, K), jnp.float32)
        self.h0 = s * jax.random.normal(ks[8], (1, H), jnp.float32)   # learn_h0=True
        self.packed = _pack_params(wc, bc, w_ih, b_ih, w_hh, b_hh, wt, bt,
                                   K, H, self.lane_pad)

    def __call__(self, x):
        # reset on any truthy flag (Python bool, numpy bool, 0/1), like `== True`
        if bool(x[-1]):
            self.hidden_01 = None

        x0 = jnp.asarray(x[0], jnp.float32)
        B = x0.shape[0]
        K, H = self.kernel_size, self.hidden_size
        T = self.frame_size // K

        if self.hidden_01 is None:
            h_init = jnp.broadcast_to(self.h0, (B, H))       # learned initial state
        else:
            h_init = self.hidden_01[0]                       # (1,B,H) -> (B,H)

        out, h_final = _run(x0, self.packed, h_init, K=K, H=H, T=T)

        # hidden kept as (1, B, H) like a torch single-layer GRU; .detach() equiv.
        self.hidden_01 = lax.stop_gradient(h_final)[None]
        return out                                            # (B, 1, frame_size)


# ----------------------------- demo / smoke test -----------------------------
if __name__ == "__main__":
    B = 2
    frame_size = 64
    kernel_size = 4
    overlap_len = 16
    hidden_size = 32

    key = jax.random.PRNGKey(0)
    audio = jax.random.normal(key, (B, 1, frame_size), jnp.float32)

    model = BWExtender(frame_size, overlap_len, kernel_size,
                       hidden_size=hidden_size, seed=0)

    # First call: reset flag True -> learned h0 is used.
    out1 = jax.block_until_ready(model((audio, True)))
    # Second call: carries hidden state from the first call.
    out2 = jax.block_until_ready(model((audio, False)))

    assert out1.shape == (B, 1, frame_size)
    assert out2.shape == (B, 1, frame_size)
    assert model.hidden_01.shape == (1, B, hidden_size)
    assert bool(jnp.all(jnp.isfinite(out1))) and bool(jnp.all(jnp.isfinite(out2)))

    print("KERNEL_OK")
</pallas_src>

<mosaic_0001>
module attributes {stable_mosaic.version = 11 : i64} {
  func.func @_bwext_kernel(%arg0: memref<32x4xf32, #tpu.memory_space<vmem>>, %arg1: memref<104x128xf32, #tpu.memory_space<vmem>>, %arg2: memref<2x32xf32, #tpu.memory_space<vmem>>, %arg3: memref<32x4xf32, #tpu.memory_space<vmem>>, %arg4: memref<2x32xf32, #tpu.memory_space<vmem>>, %arg5: memref<32x128xf32, #tpu.memory_space<vmem>>, %arg6: memref<32x32xf32, #tpu.memory_space<vmem>>) attributes {dimension_semantics = [], scalar_prefetch = 0 : i64, scratch_operands = 2 : i64, tpu.core_type = #tpu.core_type<tc>} {
    %c0 = arith.constant 0 : index
    %c0_0 = arith.constant 0 : index
    %0 = vector.load %arg1[%c0, %c0_0] : memref<104x128xf32, #tpu.memory_space<vmem>>, vector<32x128xf32>
    %1 = arith.truncf %0 : vector<32x128xf32> to vector<32x128xbf16>
    %c32 = arith.constant 32 : index
    %c0_1 = arith.constant 0 : index
    %2 = vector.load %arg1[%c32, %c0_1] : memref<104x128xf32, #tpu.memory_space<vmem>>, vector<32x128xf32>
    %3 = arith.truncf %2 : vector<32x128xf32> to vector<32x128xbf16>
    %c64 = arith.constant 64 : index
    %c0_2 = arith.constant 0 : index
    %4 = vector.load %arg1[%c64, %c0_2] : memref<104x128xf32, #tpu.memory_space<vmem>>, vector<4x32xf32>
    %5 = arith.truncf %4 : vector<4x32xf32> to vector<4x32xbf16>
    %c68 = arith.constant 68 : index
    %c0_3 = arith.constant 0 : index
    %6 = vector.load %arg1[%c68, %c0_3] : memref<104x128xf32, #tpu.memory_space<vmem>>, vector<32x4xf32>
    %7 = arith.truncf %6 : vector<32x4xf32> to vector<32x4xbf16>
    %c100 = arith.constant 100 : index
    %c0_4 = arith.constant 0 : index
    %8 = vector.load %arg1[%c100, %c0_4] : memref<104x128xf32, #tpu.memory_space<vmem>>, vector<1x128xf32>
    %c101 = arith.constant 101 : index
    %c0_5 = arith.constant 0 : index
    %9 = vector.load %arg1[%c101, %c0_5] : memref<104x128xf32, #tpu.memory_space<vmem>>, vector<1x128xf32>
    %c102 = arith.constant 102 : index
    %c0_6 = arith.constant 0 : index
    %10 = vector.load %arg1[%c102, %c0_6] : memref<104x128xf32, #tpu.memory_space<vmem>>, vector<1x32xf32>
    %c103 = arith.constant 103 : index
    %c0_7 = arith.constant 0 : index
    %11 = vector.load %arg1[%c103, %c0_7] : memref<104x128xf32, #tpu.memory_space<vmem>>, vector<1x4xf32>
    %12 = vector.shape_cast %10 : vector<1x32xf32> to vector<1x32xf32>
    %13 = vector.broadcast %12 : vector<1x32xf32> to vector<32x32xf32>
    %14 = vector.shape_cast %8 : vector<1x128xf32> to vector<1x128xf32>
    %15 = vector.broadcast %14 : vector<1x128xf32> to vector<32x128xf32>
    %16 = vector.shape_cast %9 : vector<1x128xf32> to vector<1x128xf32>
    %17 = vector.broadcast %16 : vector<1x128xf32> to vector<2x128xf32>
    %18 = vector.shape_cast %11 : vector<1x4xf32> to vector<1x4xf32>
    %19 = vector.broadcast %18 : vector<1x4xf32> to vector<32x4xf32>
    %c0_8 = arith.constant 0 : index
    %c0_9 = arith.constant 0 : index
    %20 = vector.load %arg0[%c0_8, %c0_9] : memref<32x4xf32, #tpu.memory_space<vmem>>, vector<32x4xf32>
    %21 = arith.truncf %20 : vector<32x4xf32> to vector<32x4xbf16>
    %cst = arith.constant dense<0.000000e+00> : vector<32x32xf32>
    %22 = tpu.matmul %21, %5, %cst {dimension_numbers = #tpu.dot_dimension_numbers<[1], [0], [0], [1], [0, 0, 1, 1], [], []>} : vector<32x4xbf16>, vector<4x32xbf16>, vector<32x32xf32> -> vector<32x32xf32>
    %23 = arith.addf %22, %13 : vector<32x32xf32>
    %24 = math.tanh %23 : vector<32x32xf32>
    %25 = arith.truncf %24 : vector<32x32xf32> to vector<32x32xbf16>
    %cst_10 = arith.constant dense<0.000000e+00> : vector<32x128xf32>
    %26 = tpu.matmul %25, %1, %cst_10 {dimension_numbers = #tpu.dot_dimension_numbers<[1], [0], [0], [1], [0, 0, 1, 1], [], []>} : vector<32x32xbf16>, vector<32x128xbf16>, vector<32x128xf32> -> vector<32x128xf32>
    %27 = arith.addf %26, %15 : vector<32x128xf32>
    %c0_11 = arith.constant 0 : index
    %c0_12 = arith.constant 0 : index
    %28 = vector.load %arg5[%c0_11, %c0_12] : memref<32x128xf32, #tpu.memory_space<vmem>>, vector<32x128xf32>
    tpu.vector_store %arg5[%c0_11, %c0_12], %27 {strides = array<i32>} : memref<32x128xf32, #tpu.memory_space<vmem>>, vector<32x128xf32>,
    %c0_13 = arith.constant 0 : index
    %c0_14 = arith.constant 0 : index
    %29 = vector.load %arg2[%c0_13, %c0_14] : memref<2x32xf32, #tpu.memory_space<vmem>>, vector<2x32xf32>
    %c0_15 = arith.constant 0 : index
    %c0_16 = arith.constant 0 : index
    %30 = vector.load %arg5[%c0_15, %c0_16] : memref<32x128xf32, #tpu.memory_space<vmem>>, vector<2x128xf32>
    %31 = arith.truncf %29 : vector<2x32xf32> to vector<2x32xbf16>
    %cst_17 = arith.constant dense<0.000000e+00> : vector<2x128xf32>
    %32 = tpu.matmul %31, %3, %cst_17 {dimension_numbers = #tpu.dot_dimension_numbers<[1], [0], [0], [1], [0, 0, 1, 1], [], []>} : vector<2x32xbf16>, vector<32x128xbf16>, vector<2x128xf32> -> vector<2x128xf32>
    %33 = arith.addf %32, %17 : vector<2x128xf32>
    %34 = vector.extract_strided_slice %30 {offsets = [0, 0], sizes = [2, 32], strides = [1, 1]} : vector<2x128xf32> to vector<2x32xf32>
    %35 = vector.extract_strided_slice %33 {offsets = [0, 0], sizes = [2, 32], strides = [1, 1]} : vector<2x128xf32> to vector<2x32xf32>
    %36 = arith.addf %34, %35 : vector<2x32xf32>
    %37 = arith.negf %36 : vector<2x32xf32>
    %38 = math.exp %37 : vector<2x32xf32>
    %cst_18 = arith.constant 1.000000e+00 : f32
    %39 = vector.broadcast %cst_18 : f32 to vector<2x32xf32>
    %40 = arith.addf %39, %38 : vector<2x32xf32>
    %41 = arith.divf %39, %40 : vector<2x32xf32>
    %42 = vector.extract_strided_slice %30 {offsets = [0, 32], sizes = [2, 32], strides = [1, 1]} : vector<2x128xf32> to vector<2x32xf32>
    %43 = vector.extract_strided_slice %33 {offsets = [0, 32], sizes = [2, 32], strides = [1, 1]} : vector<2x128xf32> to vector<2x32xf32>
    %44 = arith.addf %42, %43 : vector<2x32xf32>
    %45 = arith.negf %44 : vector<2x32xf32>
    %46 = math.exp %45 : vector<2x32xf32>
    %cst_19 = arith.constant 1.000000e+00 : f32
    %47 = vector.broadcast %cst_19 : f32 to vector<2x32xf32>
    %48 = arith.addf %47, %46 : vector<2x32xf32>
    %49 = arith.divf %47, %48 : vector<2x32xf32>
    %50 = vector.extract_strided_slice %30 {offsets = [0, 64], sizes = [2, 32], strides = [1, 1]} : vector<2x128xf32> to vector<2x32xf32>
    %51 = vector.extract_strided_slice %33 {offsets = [0, 64], sizes = [2, 32], strides = [1, 1]} : vector<2x128xf32> to vector<2x32xf32>
    %52 = arith.mulf %41, %51 : vector<2x32xf32>
    %53 = arith.addf %50, %52 : vector<2x32xf32>
    %54 = math.tanh %53 : vector<2x32xf32>
    %cst_20 = arith.constant 1.000000e+00 : f32
    %55 = vector.broadcast %cst_20 : f32 to vector<2x32xf32>
    %56 = arith.subf %55, %49 : vector<2x32xf32>
    %57 = arith.mulf %56, %54 : vector<2x32xf32>
    %58 = arith.mulf %49, %29 : vector<2x32xf32>
    %59 = arith.addf %57, %58 : vector<2x32xf32>
    %c0_21 = arith.constant 0 : index
    %c0_22 = arith.constant 0 : index
    %60 = vector.load %arg6[%c0_21, %c0_22] : memref<32x32xf32, #tpu.memory_space<vmem>>, vector<2x32xf32>
    tpu.vector_store %arg6[%c0_21, %c0_22], %59 {strides = array<i32>} : memref<32x32xf32, #tpu.memory_space<vmem>>, vector<2x32xf32>,
    %c2 = arith.constant 2 : index
    %c0_23 = arith.constant 0 : index
    %61 = vector.load %arg5[%c2, %c0_23] : memref<32x128xf32, #tpu.memory_space<vmem>>, vector<2x128xf32>
    %62 = arith.truncf %59 : vector<2x32xf32> to vector<2x32xbf16>
    %cst_24 = arith.constant dense<0.000000e+00> : vector<2x128xf32>
    %63 = tpu.matmul %62, %3, %cst_24 {dimension_numbers = #tpu.dot_dimension_numbers<[1], [0], [0], [1], [0, 0, 1, 1], [], []>} : vector<2x32xbf16>, vector<32x128xbf16>, vector<2x128xf32> -> vector<2x128xf32>
    %64 = arith.addf %63, %17 : vector<2x128xf32>
    %65 = vector.extract_strided_slice %61 {offsets = [0, 0], sizes = [2, 32], strides = [1, 1]} : vector<2x128xf32> to vector<2x32xf32>
    %66 = vector.extract_strided_slice %64 {offsets = [0, 0], sizes = [2, 32], strides = [1, 1]} : vector<2x128xf32> to vector<2x32xf32>
    %67 = arith.addf %65, %66 : vector<2x32xf32>
    %68 = arith.negf %67 : vector<2x32xf32>
    %69 = math.exp %68 : vector<2x32xf32>
    %cst_25 = arith.constant 1.000000e+00 : f32
    %70 = vector.broadcast %cst_25 : f32 to vector<2x32xf32>
    %71 = arith.addf %70, %69 : vector<2x32xf32>
    %72 = arith.divf %70, %71 : vector<2x32xf32>
    %73 = vector.extract_strided_slice %61 {offsets = [0, 32], sizes = [2, 32], strides = [1, 1]} : vector<2x128xf32> to vector<2x32xf32>
    %74 = vector.extract_strided_slice %64 {offsets = [0, 32], sizes = [2, 32], strides = [1, 1]} : vector<2x128xf32> to vector<2x32xf32>
    %75 = arith.addf %73, %74 : vector<2x32xf32>
    %76 = arith.negf %75 : vector<2x32xf32>
    %77 = math.exp %76 : vector<2x32xf32>
    %cst_26 = arith.constant 1.000000e+00 : f32
    %78 = vector.broadcast %cst_26 : f32 to vector<2x32xf32>
    %79 = arith.addf %78, %77 : vector<2x32xf32>
    %80 = arith.divf %78, %79 : vector<2x32xf32>
    %81 = vector.extract_strided_slice %61 {offsets = [0, 64], sizes = [2, 32], strides = [1, 1]} : vector<2x128xf32> to vector<2x32xf32>
    %82 = vector.extract_strided_slice %64 {offsets = [0, 64], sizes = [2, 32], strides = [1, 1]} : vector<2x128xf32> to vector<2x32xf32>
    %83 = arith.mulf %72, %82 : vector<2x32xf32>
    %84 = arith.addf %81, %83 : vector<2x32xf32>
    %85 = math.tanh %84 : vector<2x32xf32>
    %cst_27 = arith.constant 1.000000e+00 : f32
    %86 = vector.broadcast %cst_27 : f32 to vector<2x32xf32>
    %87 = arith.subf %86, %80 : vector<2x32xf32>
    %88 = arith.mulf %87, %85 : vector<2x32xf32>
    %89 = arith.mulf %80, %59 : vector<2x32xf32>
    %90 = arith.addf %88, %89 : vector<2x32xf32>
    %c2_28 = arith.constant 2 : index
    %c0_29 = arith.constant 0 : index
    %91 = vector.load %arg6[%c2_28, %c0_29] : memref<32x32xf32, #tpu.memory_space<vmem>>, vector<2x32xf32>
    tpu.vector_store %arg6[%c2_28, %c0_29], %90 {strides = array<i32>} : memref<32x32xf32, #tpu.memory_space<vmem>>, vector<2x32xf32>,
    %c4 = arith.constant 4 : index
    %c0_30 = arith.constant 0 : index
    %92 = vector.load %arg5[%c4, %c0_30] : memref<32x128xf32, #tpu.memory_space<vmem>>, vector<2x128xf32>
    %93 = arith.truncf %90 : vector<2x32xf32> to vector<2x32xbf16>
    %cst_31 = arith.constant dense<0.000000e+00> : vector<2x128xf32>
    %94 = tpu.matmul %93, %3, %cst_31 {dimension_numbers = #tpu.dot_dimension_numbers<[1], [0], [0], [1], [0, 0, 1, 1], [], []>} : vector<2x32xbf16>, vector<32x128xbf16>, vector<2x128xf32> -> vector<2x128xf32>
    %95 = arith.addf %94, %17 : vector<2x128xf32>
    %96 = vector.extract_strided_slice %92 {offsets = [0, 0], sizes = [2, 32], strides = [1, 1]} : vector<2x128xf32> to vector<2x32xf32>
    %97 = vector.extract_strided_slice %95 {offsets = [0, 0], sizes = [2, 32], strides = [1, 1]} : vector<2x128xf32> to vector<2x32xf32>
    %98 = arith.addf %96, %97 : vector<2x32xf32>
    %99 = arith.negf %98 : vector<2x32xf32>
    %100 = math.exp %99 : vector<2x32xf32>
    %cst_32 = arith.constant 1.000000e+00 : f32
    %101 = vector.broadcast %cst_32 : f32 to vector<2x32xf32>
    %102 = arith.addf %101, %100 : vector<2x32xf32>
    %103 = arith.divf %101, %102 : vector<2x32xf32>
    %104 = vector.extract_strided_slice %92 {offsets = [0, 32], sizes = [2, 32], strides = [1, 1]} : vector<2x128xf32> to vector<2x32xf32>
    %105 = vector.extract_strided_slice %95 {offsets = [0, 32], sizes = [2, 32], strides = [1, 1]} : vector<2x128xf32> to vector<2x32xf32>
    %106 = arith.addf %104, %105 : vector<2x32xf32>
    %107 = arith.negf %106 : vector<2x32xf32>
    %108 = math.exp %107 : vector<2x32xf32>
    %cst_33 = arith.constant 1.000000e+00 : f32
    %109 = vector.broadcast %cst_33 : f32 to vector<2x32xf32>
    %110 = arith.addf %109, %108 : vector<2x32xf32>
    %111 = arith.divf %109, %110 : vector<2x32xf32>
    %112 = vector.extract_strided_slice %92 {offsets = [0, 64], sizes = [2, 32], strides = [1, 1]} : vector<2x128xf32> to vector<2x32xf32>
    %113 = vector.extract_strided_slice %95 {offsets = [0, 64], sizes = [2, 32], strides = [1, 1]} : vector<2x128xf32> to vector<2x32xf32>
    %114 = arith.mulf %103, %113 : vector<2x32xf32>
    %115 = arith.addf %112, %114 : vector<2x32xf32>
    %116 = math.tanh %115 : vector<2x32xf32>
    %cst_34 = arith.constant 1.000000e+00 : f32
    %117 = vector.broadcast %cst_34 : f32 to vector<2x32xf32>
    %118 = arith.subf %117, %111 : vector<2x32xf32>
    %119 = arith.mulf %118, %116 : vector<2x32xf32>
    %120 = arith.mulf %111, %90 : vector<2x32xf32>
    %121 = arith.addf %119, %120 : vector<2x32xf32>
    %c4_35 = arith.constant 4 : index
    %c0_36 = arith.constant 0 : index
    %122 = vector.load %arg6[%c4_35, %c0_36] : memref<32x32xf32, #tpu.memory_space<vmem>>, vector<2x32xf32>
    tpu.vector_store %arg6[%c4_35, %c0_36], %121 {strides = array<i32>} : memref<32x32xf32, #tpu.memory_space<vmem>>, vector<2x32xf32>,
    %c6 = arith.constant 6 : index
    %c0_37 = arith.constant 0 : index
    %123 = vector.load %arg5[%c6, %c0_37] : memref<32x128xf32, #tpu.memory_space<vmem>>, vector<2x128xf32>
    %124 = arith.truncf %121 : vector<2x32xf32> to vector<2x32xbf16>
    %cst_38 = arith.constant dense<0.000000e+00> : vector<2x128xf32>
    %125 = tpu.matmul %124, %3, %cst_38 {dimension_numbers = #tpu.dot_dimension_numbers<[1], [0], [0], [1], [0, 0, 1, 1], [], []>} : vector<2x32xbf16>, vector<32x128xbf16>, vector<2x128xf32> -> vector<2x128xf32>
    %126 = arith.addf %125, %17 : vector<2x128xf32>
    %127 = vector.extract_strided_slice %123 {offsets = [0, 0], sizes = [2, 32], strides = [1, 1]} : vector<2x128xf32> to vector<2x32xf32>
    %128 = vector.extract_strided_slice %126 {offsets = [0, 0], sizes = [2, 32], strides = [1, 1]} : vector<2x128xf32> to vector<2x32xf32>
    %129 = arith.addf %127, %128 : vector<2x32xf32>
    %130 = arith.negf %129 : vector<2x32xf32>
    %131 = math.exp %130 : vector<2x32xf32>
    %cst_39 = arith.constant 1.000000e+00 : f32
    %132 = vector.broadcast %cst_39 : f32 to vector<2x32xf32>
    %133 = arith.addf %132, %131 : vector<2x32xf32>
    %134 = arith.divf %132, %133 : vector<2x32xf32>
    %135 = vector.extract_strided_slice %123 {offsets = [0, 32], sizes = [2, 32], strides = [1, 1]} : vector<2x128xf32> to vector<2x32xf32>
    %136 = vector.extract_strided_slice %126 {offsets = [0, 32], sizes = [2, 32], strides = [1, 1]} : vector<2x128xf32> to vector<2x32xf32>
    %137 = arith.addf %135, %136 : vector<2x32xf32>
    %138 = arith.negf %137 : vector<2x32xf32>
    %139 = math.exp %138 : vector<2x32xf32>
    %cst_40 = arith.constant 1.000000e+00 : f32
    %140 = vector.broadcast %cst_40 : f32 to vector<2x32xf32>
    %141 = arith.addf %140, %139 : vector<2x32xf32>
    %142 = arith.divf %140, %141 : vector<2x32xf32>
    %143 = vector.extract_strided_slice %123 {offsets = [0, 64], sizes = [2, 32], strides = [1, 1]} : vector<2x128xf32> to vector<2x32xf32>
    %144 = vector.extract_strided_slice %126 {offsets = [0, 64], sizes = [2, 32], strides = [1, 1]} : vector<2x128xf32> to vector<2x32xf32>
    %145 = arith.mulf %134, %144 : vector<2x32xf32>
    %146 = arith.addf %143, %145 : vector<2x32xf32>
    %147 = math.tanh %146 : vector<2x32xf32>
    %cst_41 = arith.constant 1.000000e+00 : f32
    %148 = vector.broadcast %cst_41 : f32 to vector<2x32xf32>
    %149 = arith.subf %148, %142 : vector<2x32xf32>
    %150 = arith.mulf %149, %147 : vector<2x32xf32>
    %151 = arith.mulf %142, %121 : vector<2x32xf32>
    %152 = arith.addf %150, %151 : vector<2x32xf32>
    %c6_42 = arith.constant 6 : index
    %c0_43 = arith.constant 0 : index
    %153 = vector.load %arg6[%c6_42, %c0_43] : memref<32x32xf32, #tpu.memory_space<vmem>>, vector<2x32xf32>
    tpu.vector_store %arg6[%c6_42, %c0_43], %152 {strides = array<i32>} : memref<32x32xf32, #tpu.memory_space<vmem>>, vector<2x32xf32>,
    %c8 = arith.constant 8 : index
    %c0_44 = arith.constant 0 : index
    %154 = vector.load %arg5[%c8, %c0_44] : memref<32x128xf32, #tpu.memory_space<vmem>>, vector<2x128xf32>
    %155 = arith.truncf %152 : vector<2x32xf32> to vector<2x32xbf16>
    %cst_45 = arith.constant dense<0.000000e+00> : vector<2x128xf32>
    %156 = tpu.matmul %155, %3, %cst_45 {dimension_numbers = #tpu.dot_dimension_numbers<[1], [0], [0], [1], [0, 0, 1, 1], [], []>} : vector<2x32xbf16>, vector<32x128xbf16>, vector<2x128xf32> -> vector<2x128xf32>
    %157 = arith.addf %156, %17 : vector<2x128xf32>
    %158 = vector.extract_strided_slice %154 {offsets = [0, 0], sizes = [2, 32], strides = [1, 1]} : vector<2x128xf32> to vector<2x32xf32>
    %159 = vector.extract_strided_slice %157 {offsets = [0, 0], sizes = [2, 32], strides = [1, 1]} : vector<2x128xf32> to vector<2x32xf32>
    %160 = arith.addf %158, %159 : vector<2x32xf32>
    %161 = arith.negf %160 : vector<2x32xf32>
    %162 = math.exp %161 : vector<2x32xf32>
    %cst_46 = arith.constant 1.000000e+00 : f32
    %163 = vector.broadcast %cst_46 : f32 to vector<2x32xf32>
    %164 = arith.addf %163, %162 : vector<2x32xf32>
    %165 = arith.divf %163, %164 : vector<2x32xf32>
    %166 = vector.extract_strided_slice %154 {offsets = [0, 32], sizes = [2, 32], strides = [1, 1]} : vector<2x128xf32> to vector<2x32xf32>
    %167 = vector.extract_strided_slice %157 {offsets = [0, 32], sizes = [2, 32], strides = [1, 1]} : vector<2x128xf32> to vector<2x32xf32>
    %168 = arith.addf %166, %167 : vector<2x32xf32>
    %169 = arith.negf %168 : vector<2x32xf32>
    %170 = math.exp %169 : vector<2x32xf32>
    %cst_47 = arith.constant 1.000000e+00 : f32
    %171 = vector.broadcast %cst_47 : f32 to vector<2x32xf32>
    %172 = arith.addf %171, %170 : vector<2x32xf32>
    %173 = arith.divf %171, %172 : vector<2x32xf32>
    %174 = vector.extract_strided_slice %154 {offsets = [0, 64], sizes = [2, 32], strides = [1, 1]} : vector<2x128xf32> to vector<2x32xf32>
    %175 = vector.extract_strided_slice %157 {offsets = [0, 64], sizes = [2, 32], strides = [1, 1]} : vector<2x128xf32> to vector<2x32xf32>
    %176 = arith.mulf %165, %175 : vector<2x32xf32>
    %177 = arith.addf %174, %176 : vector<2x32xf32>
    %178 = math.tanh %177 : vector<2x32xf32>
    %cst_48 = arith.constant 1.000000e+00 : f32
    %179 = vector.broadcast %cst_48 : f32 to vector<2x32xf32>
    %180 = arith.subf %179, %173 : vector<2x32xf32>
    %181 = arith.mulf %180, %178 : vector<2x32xf32>
    %182 = arith.mulf %173, %152 : vector<2x32xf32>
    %183 = arith.addf %181, %182 : vector<2x32xf32>
    %c8_49 = arith.constant 8 : index
    %c0_50 = arith.constant 0 : index
    %184 = vector.load %arg6[%c8_49, %c0_50] : memref<32x32xf32, #tpu.memory_space<vmem>>, vector<2x32xf32>
    tpu.vector_store %arg6[%c8_49, %c0_50], %183 {strides = array<i32>} : memref<32x32xf32, #tpu.memory_space<vmem>>, vector<2x32xf32>,
    %c10 = arith.constant 10 : index
    %c0_51 = arith.constant 0 : index
    %185 = vector.load %arg5[%c10, %c0_51] : memref<32x128xf32, #tpu.memory_space<vmem>>, vector<2x128xf32>
    %186 = arith.truncf %183 : vector<2x32xf32> to vector<2x32xbf16>
    %cst_52 = arith.constant dense<0.000000e+00> : vector<2x128xf32>
    %187 = tpu.matmul %186, %3, %cst_52 {dimension_numbers = #tpu.dot_dimension_numbers<[1], [0], [0], [1], [0, 0, 1, 1], [], []>} : vector<2x32xbf16>, vector<32x128xbf16>, vector<2x128xf32> -> vector<2x128xf32>
    %188 = arith.addf %187, %17 : vector<2x128xf32>
    %189 = vector.extract_strided_slice %185 {offsets = [0, 0], sizes = [2, 32], strides = [1, 1]} : vector<2x128xf32> to vector<2x32xf32>
    %190 = vector.extract_strided_slice %188 {offsets = [0, 0], sizes = [2, 32], strides = [1, 1]} : vector<2x128xf32> to vector<2x32xf32>
    %191 = arith.addf %189, %190 : vector<2x32xf32>
    %192 = arith.negf %191 : vector<2x32xf32>
    %193 = math.exp %192 : vector<2x32xf32>
    %cst_53 = arith.constant 1.000000e+00 : f32
    %194 = vector.broadcast %cst_53 : f32 to vector<2x32xf32>
    %195 = arith.addf %194, %193 : vector<2x32xf32>
    %196 = arith.divf %194, %195 : vector<2x32xf32>
    %197 = vector.extract_strided_slice %185 {offsets = [0, 32], sizes = [2, 32], strides = [1, 1]} : vector<2x128xf32> to vector<2x32xf32>
    %198 = vector.extract_strided_slice %188 {offsets = [0, 32], sizes = [2, 32], strides = [1, 1]} : vector<2x128xf32> to vector<2x32xf32>
    %199 = arith.addf %197, %198 : vector<2x32xf32>
    %200 = arith.negf %199 : vector<2x32xf32>
    %201 = math.exp %200 : vector<2x32xf32>
    %cst_54 = arith.constant 1.000000e+00 : f32
    %202 = vector.broadcast %cst_54 : f32 to vector<2x32xf32>
    %203 = arith.addf %202, %201 : vector<2x32xf32>
    %204 = arith.divf %202, %203 : vector<2x32xf32>
    %205 = vector.extract_strided_slice %185 {offsets = [0, 64], sizes = [2, 32], strides = [1, 1]} : vector<2x128xf32> to vector<2x32xf32>
    %206 = vector.extract_strided_slice %188 {offsets = [0, 64], sizes = [2, 32], strides = [1, 1]} : vector<2x128xf32> to vector<2x32xf32>
    %207 = arith.mulf %196, %206 : vector<2x32xf32>
    %208 = arith.addf %205, %207 : vector<2x32xf32>
    %209 = math.tanh %208 : vector<2x32xf32>
    %cst_55 = arith.constant 1.000000e+00 : f32
    %210 = vector.broadcast %cst_55 : f32 to vector<2x32xf32>
    %211 = arith.subf %210, %204 : vector<2x32xf32>
    %212 = arith.mulf %211, %209 : vector<2x32xf32>
    %213 = arith.mulf %204, %183 : vector<2x32xf32>
    %214 = arith.addf %212, %213 : vector<2x32xf32>
    %c10_56 = arith.constant 10 : index
    %c0_57 = arith.constant 0 : index
    %215 = vector.load %arg6[%c10_56, %c0_57] : memref<32x32xf32, #tpu.memory_space<vmem>>, vector<2x32xf32>
    tpu.vector_store %arg6[%c10_56, %c0_57], %214 {strides = array<i32>} : memref<32x32xf32, #tpu.memory_space<vmem>>, vector<2x32xf32>,
    %c12 = arith.constant 12 : index
    %c0_58 = arith.constant 0 : index
    %216 = vector.load %arg5[%c12, %c0_58] : memref<32x128xf32, #tpu.memory_space<vmem>>, vector<2x128xf32>
    %217 = arith.truncf %214 : vector<2x32xf32> to vector<2x32xbf16>
    %cst_59 = arith.constant dense<0.000000e+00> : vector<2x128xf32>
    %218 = tpu.matmul %217, %3, %cst_59 {dimension_numbers = #tpu.dot_dimension_numbers<[1], [0], [0], [1], [0, 0, 1, 1], [], []>} : vector<2x32xbf16>, vector<32x128xbf16>, vector<2x128xf32> -> vector<2x128xf32>
    %219 = arith.addf %218, %17 : vector<2x128xf32>
    %220 = vector.extract_strided_slice %216 {offsets = [0, 0], sizes = [2, 32], strides = [1, 1]} : vector<2x128xf32> to vector<2x32xf32>
    %221 = vector.extract_strided_slice %219 {offsets = [0, 0], sizes = [2, 32], strides = [1, 1]} : vector<2x128xf32> to vector<2x32xf32>
    %222 = arith.addf %220, %221 : vector<2x32xf32>
    %223 = arith.negf %222 : vector<2x32xf32>
    %224 = math.exp %223 : vector<2x32xf32>
    %cst_60 = arith.constant 1.000000e+00 : f32
    %225 = vector.broadcast %cst_60 : f32 to vector<2x32xf32>
    %226 = arith.addf %225, %224 : vector<2x32xf32>
    %227 = arith.divf %225, %226 : vector<2x32xf32>
    %228 = vector.extract_strided_slice %216 {offsets = [0, 32], sizes = [2, 32], strides = [1, 1]} : vector<2x128xf32> to vector<2x32xf32>
    %229 = vector.extract_strided_slice %219 {offsets = [0, 32], sizes = [2, 32], strides = [1, 1]} : vector<2x128xf32> to vector<2x32xf32>
    %230 = arith.addf %228, %229 : vector<2x32xf32>
    %231 = arith.negf %230 : vector<2x32xf32>
    %232 = math.exp %231 : vector<2x32xf32>
    %cst_61 = arith.constant 1.000000e+00 : f32
    %233 = vector.broadcast %cst_61 : f32 to vector<2x32xf32>
    %234 = arith.addf %233, %232 : vector<2x32xf32>
    %235 = arith.divf %233, %234 : vector<2x32xf32>
    %236 = vector.extract_strided_slice %216 {offsets = [0, 64], sizes = [2, 32], strides = [1, 1]} : vector<2x128xf32> to vector<2x32xf32>
    %237 = vector.extract_strided_slice %219 {offsets = [0, 64], sizes = [2, 32], strides = [1, 1]} : vector<2x128xf32> to vector<2x32xf32>
    %238 = arith.mulf %227, %237 : vector<2x32xf32>
    %239 = arith.addf %236, %238 : vector<2x32xf32>
    %240 = math.tanh %239 : vector<2x32xf32>
    %cst_62 = arith.constant 1.000000e+00 : f32
    %241 = vector.broadcast %cst_62 : f32 to vector<2x32xf32>
    %242 = arith.subf %241, %235 : vector<2x32xf32>
    %243 = arith.mulf %242, %240 : vector<2x32xf32>
    %244 = arith.mulf %235, %214 : vector<2x32xf32>
    %245 = arith.addf %243, %244 : vector<2x32xf32>
    %c12_63 = arith.constant 12 : index
    %c0_64 = arith.constant 0 : index
    %246 = vector.load %arg6[%c12_63, %c0_64] : memref<32x32xf32, #tpu.memory_space<vmem>>, vector<2x32xf32>
    tpu.vector_store %arg6[%c12_63, %c0_64], %245 {strides = array<i32>} : memref<32x32xf32, #tpu.memory_space<vmem>>, vector<2x32xf32>,
    %c14 = arith.constant 14 : index
    %c0_65 = arith.constant 0 : index
    %247 = vector.load %arg5[%c14, %c0_65] : memref<32x128xf32, #tpu.memory_space<vmem>>, vector<2x128xf32>
    %248 = arith.truncf %245 : vector<2x32xf32> to vector<2x32xbf16>
    %cst_66 = arith.constant dense<0.000000e+00> : vector<2x128xf32>
    %249 = tpu.matmul %248, %3, %cst_66 {dimension_numbers = #tpu.dot_dimension_numbers<[1], [0], [0], [1], [0, 0, 1, 1], [], []>} : vector<2x32xbf16>, vector<32x128xbf16>, vector<2x128xf32> -> vector<2x128xf32>
    %250 = arith.addf %249, %17 : vector<2x128xf32>
    %251 = vector.extract_strided_slice %247 {offsets = [0, 0], sizes = [2, 32], strides = [1, 1]} : vector<2x128xf32> to vector<2x32xf32>
    %252 = vector.extract_strided_slice %250 {offsets = [0, 0], sizes = [2, 32], strides = [1, 1]} : vector<2x128xf32> to vector<2x32xf32>
    %253 = arith.addf %251, %252 : vector<2x32xf32>
    %254 = arith.negf %253 : vector<2x32xf32>
    %255 = math.exp %254 : vector<2x32xf32>
    %cst_67 = arith.constant 1.000000e+00 : f32
    %256 = vector.broadcast %cst_67 : f32 to vector<2x32xf32>
    %257 = arith.addf %256, %255 : vector<2x32xf32>
    %258 = arith.divf %256, %257 : vector<2x32xf32>
    %259 = vector.extract_strided_slice %247 {offsets = [0, 32], sizes = [2, 32], strides = [1, 1]} : vector<2x128xf32> to vector<2x32xf32>
    %260 = vector.extract_strided_slice %250 {offsets = [0, 32], sizes = [2, 32], strides = [1, 1]} : vector<2x128xf32> to vector<2x32xf32>
    %261 = arith.addf %259, %260 : vector<2x32xf32>
    %262 = arith.negf %261 : vector<2x32xf32>
    %263 = math.exp %262 : vector<2x32xf32>
    %cst_68 = arith.constant 1.000000e+00 : f32
    %264 = vector.broadcast %cst_68 : f32 to vector<2x32xf32>
    %265 = arith.addf %264, %263 : vector<2x32xf32>
    %266 = arith.divf %264, %265 : vector<2x32xf32>
    %267 = vector.extract_strided_slice %247 {offsets = [0, 64], sizes = [2, 32], strides = [1, 1]} : vector<2x128xf32> to vector<2x32xf32>
    %268 = vector.extract_strided_slice %250 {offsets = [0, 64], sizes = [2, 32], strides = [1, 1]} : vector<2x128xf32> to vector<2x32xf32>
    %269 = arith.mulf %258, %268 : vector<2x32xf32>
    %270 = arith.addf %267, %269 : vector<2x32xf32>
    %271 = math.tanh %270 : vector<2x32xf32>
    %cst_69 = arith.constant 1.000000e+00 : f32
    %272 = vector.broadcast %cst_69 : f32 to vector<2x32xf32>
    %273 = arith.subf %272, %266 : vector<2x32xf32>
    %274 = arith.mulf %273, %271 : vector<2x32xf32>
    %275 = arith.mulf %266, %245 : vector<2x32xf32>
    %276 = arith.addf %274, %275 : vector<2x32xf32>
    %c14_70 = arith.constant 14 : index
    %c0_71 = arith.constant 0 : index
    %277 = vector.load %arg6[%c14_70, %c0_71] : memref<32x32xf32, #tpu.memory_space<vmem>>, vector<2x32xf32>
    tpu.vector_store %arg6[%c14_70, %c0_71], %276 {strides = array<i32>} : memref<32x32xf32, #tpu.memory_space<vmem>>, vector<2x32xf32>,
    %c16 = arith.constant 16 : index
    %c0_72 = arith.constant 0 : index
    %278 = vector.load %arg5[%c16, %c0_72] : memref<32x128xf32, #tpu.memory_space<vmem>>, vector<2x128xf32>
    %279 = arith.truncf %276 : vector<2x32xf32> to vector<2x32xbf16>
    %cst_73 = arith.constant dense<0.000000e+00> : vector<2x128xf32>
    %280 = tpu.matmul %279, %3, %cst_73 {dimension_numbers = #tpu.dot_dimension_numbers<[1], [0], [0], [1], [0, 0, 1, 1], [], []>} : vector<2x32xbf16>, vector<32x128xbf16>, vector<2x128xf32> -> vector<2x128xf32>
    %281 = arith.addf %280, %17 : vector<2x128xf32>
    %282 = vector.extract_strided_slice %278 {offsets = [0, 0], sizes = [2, 32], strides = [1, 1]} : vector<2x128xf32> to vector<2x32xf32>
    %283 = vector.extract_strided_slice %281 {offsets = [0, 0], sizes = [2, 32], strides = [1, 1]} : vector<2x128xf32> to vector<2x32xf32>
    %284 = arith.addf %282, %283 : vector<2x32xf32>
    %285 = arith.negf %284 : vector<2x32xf32>
    %286 = math.exp %285 : vector<2x32xf32>
    %cst_74 = arith.constant 1.000000e+00 : f32
    %287 = vector.broadcast %cst_74 : f32 to vector<2x32xf32>
    %288 = arith.addf %287, %286 : vector<2x32xf32>
    %289 = arith.divf %287, %288 : vector<2x32xf32>
    %290 = vector.extract_strided_slice %278 {offsets = [0, 32], sizes = [2, 32], strides = [1, 1]} : vector<2x128xf32> to vector<2x32xf32>
    %291 = vector.extract_strided_slice %281 {offsets = [0, 32], sizes = [2, 32], strides = [1, 1]} : vector<2x128xf32> to vector<2x32xf32>
    %292 = arith.addf %290, %291 : vector<2x32xf32>
    %293 = arith.negf %292 : vector<2x32xf32>
    %294 = math.exp %293 : vector<2x32xf32>
    %cst_75 = arith.constant 1.000000e+00 : f32
    %295 = vector.broadcast %cst_75 : f32 to vector<2x32xf32>
    %296 = arith.addf %295, %294 : vector<2x32xf32>
    %297 = arith.divf %295, %296 : vector<2x32xf32>
    %298 = vector.extract_strided_slice %278 {offsets = [0, 64], sizes = [2, 32], strides = [1, 1]} : vector<2x128xf32> to vector<2x32xf32>
    %299 = vector.extract_strided_slice %281 {offsets = [0, 64], sizes = [2, 32], strides = [1, 1]} : vector<2x128xf32> to vector<2x32xf32>
    %300 = arith.mulf %289, %299 : vector<2x32xf32>
    %301 = arith.addf %298, %300 : vector<2x32xf32>
    %302 = math.tanh %301 : vector<2x32xf32>
    %cst_76 = arith.constant 1.000000e+00 : f32
    %303 = vector.broadcast %cst_76 : f32 to vector<2x32xf32>
    %304 = arith.subf %303, %297 : vector<2x32xf32>
    %305 = arith.mulf %304, %302 : vector<2x32xf32>
    %306 = arith.mulf %297, %276 : vector<2x32xf32>
    %307 = arith.addf %305, %306 : vector<2x32xf32>
    %c16_77 = arith.constant 16 : index
    %c0_78 = arith.constant 0 : index
    %308 = vector.load %arg6[%c16_77, %c0_78] : memref<32x32xf32, #tpu.memory_space<vmem>>, vector<2x32xf32>
    tpu.vector_store %arg6[%c16_77, %c0_78], %307 {strides = array<i32>} : memref<32x32xf32, #tpu.memory_space<vmem>>, vector<2x32xf32>,
    %c18 = arith.constant 18 : index
    %c0_79 = arith.constant 0 : index
    %309 = vector.load %arg5[%c18, %c0_79] : memref<32x128xf32, #tpu.memory_space<vmem>>, vector<2x128xf32>
    %310 = arith.truncf %307 : vector<2x32xf32> to vector<2x32xbf16>
    %cst_80 = arith.constant dense<0.000000e+00> : vector<2x128xf32>
    %311 = tpu.matmul %310, %3, %cst_80 {dimension_numbers = #tpu.dot_dimension_numbers<[1], [0], [0], [1], [0, 0, 1, 1], [], []>} : vector<2x32xbf16>, vector<32x128xbf16>, vector<2x128xf32> -> vector<2x128xf32>
    %312 = arith.addf %311, %17 : vector<2x128xf32>
    %313 = vector.extract_strided_slice %309 {offsets = [0, 0], sizes = [2, 32], strides = [1, 1]} : vector<2x128xf32> to vector<2x32xf32>
    %314 = vector.extract_strided_slice %312 {offsets = [0, 0], sizes = [2, 32], strides = [1, 1]} : vector<2x128xf32> to vector<2x32xf32>
    %315 = arith.addf %313, %314 : vector<2x32xf32>
    %316 = arith.negf %315 : vector<2x32xf32>
    %317 = math.exp %316 : vector<2x32xf32>
    %cst_81 = arith.constant 1.000000e+00 : f32
    %318 = vector.broadcast %cst_81 : f32 to vector<2x32xf32>
    %319 = arith.addf %318, %317 : vector<2x32xf32>
    %320 = arith.divf %318, %319 : vector<2x32xf32>
    %321 = vector.extract_strided_slice %309 {offsets = [0, 32], sizes = [2, 32], strides = [1, 1]} : vector<2x128xf32> to vector<2x32xf32>
    %322 = vector.extract_strided_slice %312 {offsets = [0, 32], sizes = [2, 32], strides = [1, 1]} : vector<2x128xf32> to vector<2x32xf32>
    %323 = arith.addf %321, %322 : vector<2x32xf32>
    %324 = arith.negf %323 : vector<2x32xf32>
    %325 = math.exp %324 : vector<2x32xf32>
    %cst_82 = arith.constant 1.000000e+00 : f32
    %326 = vector.broadcast %cst_82 : f32 to vector<2x32xf32>
    %327 = arith.addf %326, %325 : vector<2x32xf32>
    %328 = arith.divf %326, %327 : vector<2x32xf32>
    %329 = vector.extract_strided_slice %309 {offsets = [0, 64], sizes = [2, 32], strides = [1, 1]} : vector<2x128xf32> to vector<2x32xf32>
    %330 = vector.extract_strided_slice %312 {offsets = [0, 64], sizes = [2, 32], strides = [1, 1]} : vector<2x128xf32> to vector<2x32xf32>
    %331 = arith.mulf %320, %330 : vector<2x32xf32>
    %332 = arith.addf %329, %331 : vector<2x32xf32>
    %333 = math.tanh %332 : vector<2x32xf32>
    %cst_83 = arith.constant 1.000000e+00 : f32
    %334 = vector.broadcast %cst_83 : f32 to vector<2x32xf32>
    %335 = arith.subf %334, %328 : vector<2x32xf32>
    %336 = arith.mulf %335, %333 : vector<2x32xf32>
    %337 = arith.mulf %328, %307 : vector<2x32xf32>
    %338 = arith.addf %336, %337 : vector<2x32xf32>
    %c18_84 = arith.constant 18 : index
    %c0_85 = arith.constant 0 : index
    %339 = vector.load %arg6[%c18_84, %c0_85] : memref<32x32xf32, #tpu.memory_space<vmem>>, vector<2x32xf32>
    tpu.vector_store %arg6[%c18_84, %c0_85], %338 {strides = array<i32>} : memref<32x32xf32, #tpu.memory_space<vmem>>, vector<2x32xf32>,
    %c20 = arith.constant 20 : index
    %c0_86 = arith.constant 0 : index
    %340 = vector.load %arg5[%c20, %c0_86] : memref<32x128xf32, #tpu.memory_space<vmem>>, vector<2x128xf32>
    %341 = arith.truncf %338 : vector<2x32xf32> to vector<2x32xbf16>
    %cst_87 = arith.constant dense<0.000000e+00> : vector<2x128xf32>
    %342 = tpu.matmul %341, %3, %cst_87 {dimension_numbers = #tpu.dot_dimension_numbers<[1], [0], [0], [1], [0, 0, 1, 1], [], []>} : vector<2x32xbf16>, vector<32x128xbf16>, vector<2x128xf32> -> vector<2x128xf32>
    %343 = arith.addf %342, %17 : vector<2x128xf32>
    %344 = vector.extract_strided_slice %340 {offsets = [0, 0], sizes = [2, 32], strides = [1, 1]} : vector<2x128xf32> to vector<2x32xf32>
    %345 = vector.extract_strided_slice %343 {offsets = [0, 0], sizes = [2, 32], strides = [1, 1]} : vector<2x128xf32> to vector<2x32xf32>
    %346 = arith.addf %344, %345 : vector<2x32xf32>
    %347 = arith.negf %346 : vector<2x32xf32>
    %348 = math.exp %347 : vector<2x32xf32>
    %cst_88 = arith.constant 1.000000e+00 : f32
    %349 = vector.broadcast %cst_88 : f32 to vector<2x32xf32>
    %350 = arith.addf %349, %348 : vector<2x32xf32>
    %351 = arith.divf %349, %350 : vector<2x32xf32>
    %352 = vector.extract_strided_slice %340 {offsets = [0, 32], sizes = [2, 32], strides = [1, 1]} : vector<2x128xf32> to vector<2x32xf32>
    %353 = vector.extract_strided_slice %343 {offsets = [0, 32], sizes = [2, 32], strides = [1, 1]} : vector<2x128xf32> to vector<2x32xf32>
    %354 = arith.addf %352, %353 : vector<2x32xf32>
    %355 = arith.negf %354 : vector<2x32xf32>
    %356 = math.exp %355 : vector<2x32xf32>
    %cst_89 = arith.constant 1.000000e+00 : f32
    %357 = vector.broadcast %cst_89 : f32 to vector<2x32xf32>
    %358 = arith.addf %357, %356 : vector<2x32xf32>
    %359 = arith.divf %357, %358 : vector<2x32xf32>
    %360 = vector.extract_strided_slice %340 {offsets = [0, 64], sizes = [2, 32], strides = [1, 1]} : vector<2x128xf32> to vector<2x32xf32>
    %361 = vector.extract_strided_slice %343 {offsets = [0, 64], sizes = [2, 32], strides = [1, 1]} : vector<2x128xf32> to vector<2x32xf32>
    %362 = arith.mulf %351, %361 : vector<2x32xf32>
    %363 = arith.addf %360, %362 : vector<2x32xf32>
    %364 = math.tanh %363 : vector<2x32xf32>
    %cst_90 = arith.constant 1.000000e+00 : f32
    %365 = vector.broadcast %cst_90 : f32 to vector<2x32xf32>
    %366 = arith.subf %365, %359 : vector<2x32xf32>
    %367 = arith.mulf %366, %364 : vector<2x32xf32>
    %368 = arith.mulf %359, %338 : vector<2x32xf32>
    %369 = arith.addf %367, %368 : vector<2x32xf32>
    %c20_91 = arith.constant 20 : index
    %c0_92 = arith.constant 0 : index
    %370 = vector.load %arg6[%c20_91, %c0_92] : memref<32x32xf32, #tpu.memory_space<vmem>>, vector<2x32xf32>
    tpu.vector_store %arg6[%c20_91, %c0_92], %369 {strides = array<i32>} : memref<32x32xf32, #tpu.memory_space<vmem>>, vector<2x32xf32>,
    %c22 = arith.constant 22 : index
    %c0_93 = arith.constant 0 : index
    %371 = vector.load %arg5[%c22, %c0_93] : memref<32x128xf32, #tpu.memory_space<vmem>>, vector<2x128xf32>
    %372 = arith.truncf %369 : vector<2x32xf32> to vector<2x32xbf16>
    %cst_94 = arith.constant dense<0.000000e+00> : vector<2x128xf32>
    %373 = tpu.matmul %372, %3, %cst_94 {dimension_numbers = #tpu.dot_dimension_numbers<[1], [0], [0], [1], [0, 0, 1, 1], [], []>} : vector<2x32xbf16>, vector<32x128xbf16>, vector<2x128xf32> -> vector<2x128xf32>
    %374 = arith.addf %373, %17 : vector<2x128xf32>
    %375 = vector.extract_strided_slice %371 {offsets = [0, 0], sizes = [2, 32], strides = [1, 1]} : vector<2x128xf32> to vector<2x32xf32>
    %376 = vector.extract_strided_slice %374 {offsets = [0, 0], sizes = [2, 32], strides = [1, 1]} : vector<2x128xf32> to vector<2x32xf32>
    %377 = arith.addf %375, %376 : vector<2x32xf32>
    %378 = arith.negf %377 : vector<2x32xf32>
    %379 = math.exp %378 : vector<2x32xf32>
    %cst_95 = arith.constant 1.000000e+00 : f32
    %380 = vector.broadcast %cst_95 : f32 to vector<2x32xf32>
    %381 = arith.addf %380, %379 : vector<2x32xf32>
    %382 = arith.divf %380, %381 : vector<2x32xf32>
    %383 = vector.extract_strided_slice %371 {offsets = [0, 32], sizes = [2, 32], strides = [1, 1]} : vector<2x128xf32> to vector<2x32xf32>
    %384 = vector.extract_strided_slice %374 {offsets = [0, 32], sizes = [2, 32], strides = [1, 1]} : vector<2x128xf32> to vector<2x32xf32>
    %385 = arith.addf %383, %384 : vector<2x32xf32>
    %386 = arith.negf %385 : vector<2x32xf32>
    %387 = math.exp %386 : vector<2x32xf32>
    %cst_96 = arith.constant 1.000000e+00 : f32
    %388 = vector.broadcast %cst_96 : f32 to vector<2x32xf32>
    %389 = arith.addf %388, %387 : vector<2x32xf32>
    %390 = arith.divf %388, %389 : vector<2x32xf32>
    %391 = vector.extract_strided_slice %371 {offsets = [0, 64], sizes = [2, 32], strides = [1, 1]} : vector<2x128xf32> to vector<2x32xf32>
    %392 = vector.extract_strided_slice %374 {offsets = [0, 64], sizes = [2, 32], strides = [1, 1]} : vector<2x128xf32> to vector<2x32xf32>
    %393 = arith.mulf %382, %392 : vector<2x32xf32>
    %394 = arith.addf %391, %393 : vector<2x32xf32>
    %395 = math.tanh %394 : vector<2x32xf32>
    %cst_97 = arith.constant 1.000000e+00 : f32
    %396 = vector.broadcast %cst_97 : f32 to vector<2x32xf32>
    %397 = arith.subf %396, %390 : vector<2x32xf32>
    %398 = arith.mulf %397, %395 : vector<2x32xf32>
    %399 = arith.mulf %390, %369 : vector<2x32xf32>
    %400 = arith.addf %398, %399 : vector<2x32xf32>
    %c22_98 = arith.constant 22 : index
    %c0_99 = arith.constant 0 : index
    %401 = vector.load %arg6[%c22_98, %c0_99] : memref<32x32xf32, #tpu.memory_space<vmem>>, vector<2x32xf32>
    tpu.vector_store %arg6[%c22_98, %c0_99], %400 {strides = array<i32>} : memref<32x32xf32, #tpu.memory_space<vmem>>, vector<2x32xf32>,
    %c24 = arith.constant 24 : index
    %c0_100 = arith.constant 0 : index
    %402 = vector.load %arg5[%c24, %c0_100] : memref<32x128xf32, #tpu.memory_space<vmem>>, vector<2x128xf32>
    %403 = arith.truncf %400 : vector<2x32xf32> to vector<2x32xbf16>
    %cst_101 = arith.constant dense<0.000000e+00> : vector<2x128xf32>
    %404 = tpu.matmul %403, %3, %cst_101 {dimension_numbers = #tpu.dot_dimension_numbers<[1], [0], [0], [1], [0, 0, 1, 1], [], []>} : vector<2x32xbf16>, vector<32x128xbf16>, vector<2x128xf32> -> vector<2x128xf32>
    %405 = arith.addf %404, %17 : vector<2x128xf32>
    %406 = vector.extract_strided_slice %402 {offsets = [0, 0], sizes = [2, 32], strides = [1, 1]} : vector<2x128xf32> to vector<2x32xf32>
    %407 = vector.extract_strided_slice %405 {offsets = [0, 0], sizes = [2, 32], strides = [1, 1]} : vector<2x128xf32> to vector<2x32xf32>
    %408 = arith.addf %406, %407 : vector<2x32xf32>
    %409 = arith.negf %408 : vector<2x32xf32>
    %410 = math.exp %409 : vector<2x32xf32>
    %cst_102 = arith.constant 1.000000e+00 : f32
    %411 = vector.broadcast %cst_102 : f32 to vector<2x32xf32>
    %412 = arith.addf %411, %410 : vector<2x32xf32>
    %413 = arith.divf %411, %412 : vector<2x32xf32>
    %414 = vector.extract_strided_slice %402 {offsets = [0, 32], sizes = [2, 32], strides = [1, 1]} : vector<2x128xf32> to vector<2x32xf32>
    %415 = vector.extract_strided_slice %405 {offsets = [0, 32], sizes = [2, 32], strides = [1, 1]} : vector<2x128xf32> to vector<2x32xf32>
    %416 = arith.addf %414, %415 : vector<2x32xf32>
    %417 = arith.negf %416 : vector<2x32xf32>
    %418 = math.exp %417 : vector<2x32xf32>
    %cst_103 = arith.constant 1.000000e+00 : f32
    %419 = vector.broadcast %cst_103 : f32 to vector<2x32xf32>
    %420 = arith.addf %419, %418 : vector<2x32xf32>
    %421 = arith.divf %419, %420 : vector<2x32xf32>
    %422 = vector.extract_strided_slice %402 {offsets = [0, 64], sizes = [2, 32], strides = [1, 1]} : vector<2x128xf32> to vector<2x32xf32>
    %423 = vector.extract_strided_slice %405 {offsets = [0, 64], sizes = [2, 32], strides = [1, 1]} : vector<2x128xf32> to vector<2x32xf32>
    %424 = arith.mulf %413, %423 : vector<2x32xf32>
    %425 = arith.addf %422, %424 : vector<2x32xf32>
    %426 = math.tanh %425 : vector<2x32xf32>
    %cst_104 = arith.constant 1.000000e+00 : f32
    %427 = vector.broadcast %cst_104 : f32 to vector<2x32xf32>
    %428 = arith.subf %427, %421 : vector<2x32xf32>
    %429 = arith.mulf %428, %426 : vector<2x32xf32>
    %430 = arith.mulf %421, %400 : vector<2x32xf32>
    %431 = arith.addf %429, %430 : vector<2x32xf32>
    %c24_105 = arith.constant 24 : index
    %c0_106 = arith.constant 0 : index
    %432 = vector.load %arg6[%c24_105, %c0_106] : memref<32x32xf32, #tpu.memory_space<vmem>>, vector<2x32xf32>
    tpu.vector_store %arg6[%c24_105, %c0_106], %431 {strides = array<i32>} : memref<32x32xf32, #tpu.memory_space<vmem>>, vector<2x32xf32>,
    %c26 = arith.constant 26 : index
    %c0_107 = arith.constant 0 : index
    %433 = vector.load %arg5[%c26, %c0_107] : memref<32x128xf32, #tpu.memory_space<vmem>>, vector<2x128xf32>
    %434 = arith.truncf %431 : vector<2x32xf32> to vector<2x32xbf16>
    %cst_108 = arith.constant dense<0.000000e+00> : vector<2x128xf32>
    %435 = tpu.matmul %434, %3, %cst_108 {dimension_numbers = #tpu.dot_dimension_numbers<[1], [0], [0], [1], [0, 0, 1, 1], [], []>} : vector<2x32xbf16>, vector<32x128xbf16>, vector<2x128xf32> -> vector<2x128xf32>
    %436 = arith.addf %435, %17 : vector<2x128xf32>
    %437 = vector.extract_strided_slice %433 {offsets = [0, 0], sizes = [2, 32], strides = [1, 1]} : vector<2x128xf32> to vector<2x32xf32>
    %438 = vector.extract_strided_slice %436 {offsets = [0, 0], sizes = [2, 32], strides = [1, 1]} : vector<2x128xf32> to vector<2x32xf32>
    %439 = arith.addf %437, %438 : vector<2x32xf32>
    %440 = arith.negf %439 : vector<2x32xf32>
    %441 = math.exp %440 : vector<2x32xf32>
    %cst_109 = arith.constant 1.000000e+00 : f32
    %442 = vector.broadcast %cst_109 : f32 to vector<2x32xf32>
    %443 = arith.addf %442, %441 : vector<2x32xf32>
    %444 = arith.divf %442, %443 : vector<2x32xf32>
    %445 = vector.extract_strided_slice %433 {offsets = [0, 32], sizes = [2, 32], strides = [1, 1]} : vector<2x128xf32> to vector<2x32xf32>
    %446 = vector.extract_strided_slice %436 {offsets = [0, 32], sizes = [2, 32], strides = [1, 1]} : vector<2x128xf32> to vector<2x32xf32>
    %447 = arith.addf %445, %446 : vector<2x32xf32>
    %448 = arith.negf %447 : vector<2x32xf32>
    %449 = math.exp %448 : vector<2x32xf32>
    %cst_110 = arith.constant 1.000000e+00 : f32
    %450 = vector.broadcast %cst_110 : f32 to vector<2x32xf32>
    %451 = arith.addf %450, %449 : vector<2x32xf32>
    %452 = arith.divf %450, %451 : vector<2x32xf32>
    %453 = vector.extract_strided_slice %433 {offsets = [0, 64], sizes = [2, 32], strides = [1, 1]} : vector<2x128xf32> to vector<2x32xf32>
    %454 = vector.extract_strided_slice %436 {offsets = [0, 64], sizes = [2, 32], strides = [1, 1]} : vector<2x128xf32> to vector<2x32xf32>
    %455 = arith.mulf %444, %454 : vector<2x32xf32>
    %456 = arith.addf %453, %455 : vector<2x32xf32>
    %457 = math.tanh %456 : vector<2x32xf32>
    %cst_111 = arith.constant 1.000000e+00 : f32
    %458 = vector.broadcast %cst_111 : f32 to vector<2x32xf32>
    %459 = arith.subf %458, %452 : vector<2x32xf32>
    %460 = arith.mulf %459, %457 : vector<2x32xf32>
    %461 = arith.mulf %452, %431 : vector<2x32xf32>
    %462 = arith.addf %460, %461 : vector<2x32xf32>
    %c26_112 = arith.constant 26 : index
    %c0_113 = arith.constant 0 : index
    %463 = vector.load %arg6[%c26_112, %c0_113] : memref<32x32xf32, #tpu.memory_space<vmem>>, vector<2x32xf32>
    tpu.vector_store %arg6[%c26_112, %c0_113], %462 {strides = array<i32>} : memref<32x32xf32, #tpu.memory_space<vmem>>, vector<2x32xf32>,
    %c28 = arith.constant 28 : index
    %c0_114 = arith.constant 0 : index
    %464 = vector.load %arg5[%c28, %c0_114] : memref<32x128xf32, #tpu.memory_space<vmem>>, vector<2x128xf32>
    %465 = arith.truncf %462 : vector<2x32xf32> to vector<2x32xbf16>
    %cst_115 = arith.constant dense<0.000000e+00> : vector<2x128xf32>
    %466 = tpu.matmul %465, %3, %cst_115 {dimension_numbers = #tpu.dot_dimension_numbers<[1], [0], [0], [1], [0, 0, 1, 1], [], []>} : vector<2x32xbf16>, vector<32x128xbf16>, vector<2x128xf32> -> vector<2x128xf32>
    %467 = arith.addf %466, %17 : vector<2x128xf32>
    %468 = vector.extract_strided_slice %464 {offsets = [0, 0], sizes = [2, 32], strides = [1, 1]} : vector<2x128xf32> to vector<2x32xf32>
    %469 = vector.extract_strided_slice %467 {offsets = [0, 0], sizes = [2, 32], strides = [1, 1]} : vector<2x128xf32> to vector<2x32xf32>
    %470 = arith.addf %468, %469 : vector<2x32xf32>
    %471 = arith.negf %470 : vector<2x32xf32>
    %472 = math.exp %471 : vector<2x32xf32>
    %cst_116 = arith.constant 1.000000e+00 : f32
    %473 = vector.broadcast %cst_116 : f32 to vector<2x32xf32>
    %474 = arith.addf %473, %472 : vector<2x32xf32>
    %475 = arith.divf %473, %474 : vector<2x32xf32>
    %476 = vector.extract_strided_slice %464 {offsets = [0, 32], sizes = [2, 32], strides = [1, 1]} : vector<2x128xf32> to vector<2x32xf32>
    %477 = vector.extract_strided_slice %467 {offsets = [0, 32], sizes = [2, 32], strides = [1, 1]} : vector<2x128xf32> to vector<2x32xf32>
    %478 = arith.addf %476, %477 : vector<2x32xf32>
    %479 = arith.negf %478 : vector<2x32xf32>
    %480 = math.exp %479 : vector<2x32xf32>
    %cst_117 = arith.constant 1.000000e+00 : f32
    %481 = vector.broadcast %cst_117 : f32 to vector<2x32xf32>
    %482 = arith.addf %481, %480 : vector<2x32xf32>
    %483 = arith.divf %481, %482 : vector<2x32xf32>
    %484 = vector.extract_strided_slice %464 {offsets = [0, 64], sizes = [2, 32], strides = [1, 1]} : vector<2x128xf32> to vector<2x32xf32>
    %485 = vector.extract_strided_slice %467 {offsets = [0, 64], sizes = [2, 32], strides = [1, 1]} : vector<2x128xf32> to vector<2x32xf32>
    %486 = arith.mulf %475, %485 : vector<2x32xf32>
    %487 = arith.addf %484, %486 : vector<2x32xf32>
    %488 = math.tanh %487 : vector<2x32xf32>
    %cst_118 = arith.constant 1.000000e+00 : f32
    %489 = vector.broadcast %cst_118 : f32 to vector<2x32xf32>
    %490 = arith.subf %489, %483 : vector<2x32xf32>
    %491 = arith.mulf %490, %488 : vector<2x32xf32>
    %492 = arith.mulf %483, %462 : vector<2x32xf32>
    %493 = arith.addf %491, %492 : vector<2x32xf32>
    %c28_119 = arith.constant 28 : index
    %c0_120 = arith.constant 0 : index
    %494 = vector.load %arg6[%c28_119, %c0_120] : memref<32x32xf32, #tpu.memory_space<vmem>>, vector<2x32xf32>
    tpu.vector_store %arg6[%c28_119, %c0_120], %493 {strides = array<i32>} : memref<32x32xf32, #tpu.memory_space<vmem>>, vector<2x32xf32>,
    %c30 = arith.constant 30 : index
    %c0_121 = arith.constant 0 : index
    %495 = vector.load %arg5[%c30, %c0_121] : memref<32x128xf32, #tpu.memory_space<vmem>>, vector<2x128xf32>
    %496 = arith.truncf %493 : vector<2x32xf32> to vector<2x32xbf16>
    %cst_122 = arith.constant dense<0.000000e+00> : vector<2x128xf32>
    %497 = tpu.matmul %496, %3, %cst_122 {dimension_numbers = #tpu.dot_dimension_numbers<[1], [0], [0], [1], [0, 0, 1, 1], [], []>} : vector<2x32xbf16>, vector<32x128xbf16>, vector<2x128xf32> -> vector<2x128xf32>
    %498 = arith.addf %497, %17 : vector<2x128xf32>
    %499 = vector.extract_strided_slice %495 {offsets = [0, 0], sizes = [2, 32], strides = [1, 1]} : vector<2x128xf32> to vector<2x32xf32>
    %500 = vector.extract_strided_slice %498 {offsets = [0, 0], sizes = [2, 32], strides = [1, 1]} : vector<2x128xf32> to vector<2x32xf32>
    %501 = arith.addf %499, %500 : vector<2x32xf32>
    %502 = arith.negf %501 : vector<2x32xf32>
    %503 = math.exp %502 : vector<2x32xf32>
    %cst_123 = arith.constant 1.000000e+00 : f32
    %504 = vector.broadcast %cst_123 : f32 to vector<2x32xf32>
    %505 = arith.addf %504, %503 : vector<2x32xf32>
    %506 = arith.divf %504, %505 : vector<2x32xf32>
    %507 = vector.extract_strided_slice %495 {offsets = [0, 32], sizes = [2, 32], strides = [1, 1]} : vector<2x128xf32> to vector<2x32xf32>
    %508 = vector.extract_strided_slice %498 {offsets = [0, 32], sizes = [2, 32], strides = [1, 1]} : vector<2x128xf32> to vector<2x32xf32>
    %509 = arith.addf %507, %508 : vector<2x32xf32>
    %510 = arith.negf %509 : vector<2x32xf32>
    %511 = math.exp %510 : vector<2x32xf32>
    %cst_124 = arith.constant 1.000000e+00 : f32
    %512 = vector.broadcast %cst_124 : f32 to vector<2x32xf32>
    %513 = arith.addf %512, %511 : vector<2x32xf32>
    %514 = arith.divf %512, %513 : vector<2x32xf32>
    %515 = vector.extract_strided_slice %495 {offsets = [0, 64], sizes = [2, 32], strides = [1, 1]} : vector<2x128xf32> to vector<2x32xf32>
    %516 = vector.extract_strided_slice %498 {offsets = [0, 64], sizes = [2, 32], strides = [1, 1]} : vector<2x128xf32> to vector<2x32xf32>
    %517 = arith.mulf %506, %516 : vector<2x32xf32>
    %518 = arith.addf %515, %517 : vector<2x32xf32>
    %519 = math.tanh %518 : vector<2x32xf32>
    %cst_125 = arith.constant 1.000000e+00 : f32
    %520 = vector.broadcast %cst_125 : f32 to vector<2x32xf32>
    %521 = arith.subf %520, %514 : vector<2x32xf32>
    %522 = arith.mulf %521, %519 : vector<2x32xf32>
    %523 = arith.mulf %514, %493 : vector<2x32xf32>
    %524 = arith.addf %522, %523 : vector<2x32xf32>
    %c30_126 = arith.constant 30 : index
    %c0_127 = arith.constant 0 : index
    %525 = vector.load %arg6[%c30_126, %c0_127] : memref<32x32xf32, #tpu.memory_space<vmem>>, vector<2x32xf32>
    tpu.vector_store %arg6[%c30_126, %c0_127], %524 {strides = array<i32>} : memref<32x32xf32, #tpu.memory_space<vmem>>, vector<2x32xf32>,
    %c0_128 = arith.constant 0 : index
    %c0_129 = arith.constant 0 : index
    %526 = vector.load %arg4[%c0_128, %c0_129] : memref<2x32xf32, #tpu.memory_space<vmem>>, vector<2x32xf32>
    tpu.vector_store %arg4[%c0_128, %c0_129], %524 {strides = array<i32>} : memref<2x32xf32, #tpu.memory_space<vmem>>, vector<2x32xf32>,
    %c0_130 = arith.constant 0 : index
    %c0_131 = arith.constant 0 : index
    %527 = vector.load %arg6[%c0_130, %c0_131] : memref<32x32xf32, #tpu.memory_space<vmem>>, vector<32x32xf32>
    %528 = arith.truncf %527 : vector<32x32xf32> to vector<32x32xbf16>
    %cst_132 = arith.constant dense<0.000000e+00> : vector<32x4xf32>
    %529 = tpu.matmul %528, %7, %cst_132 {dimension_numbers = #tpu.dot_dimension_numbers<[1], [0], [0], [1], [0, 0, 1, 1], [], []>} : vector<32x32xbf16>, vector<32x4xbf16>, vector<32x4xf32> -> vector<32x4xf32>
    %530 = arith.addf %529, %19 : vector<32x4xf32>
    %c0_133 = arith.constant 0 : index
    %c0_134 = arith.constant 0 : index
    %531 = vector.load %arg3[%c0_133, %c0_134] : memref<32x4xf32, #tpu.memory_space<vmem>>, vector<32x4xf32>
    tpu.vector_store %arg3[%c0_133, %c0_134], %530 {strides = array<i32>} : memref<32x4xf32, #tpu.memory_space<vmem>>, vector<32x4xf32>,
    return
  }
}

</mosaic_0001>

<bundles_post_ra>
// kernel: _run_impl.1
= control target key start
LH: loop header
LB: loop body
LE: loop exit
PB: predicated region body
PF: predicated region fallthrough
CT: control target
= control target key end

     0   :  { %vm70_vm0 = vcmask 1041408   ;;  %vm63_vm1 = vcmask 31744   ;;  %v1892_v12 = vmov 0.0   ;;  %vm1893_vm2 = vmmov 0   ;;  %s1894_s19 = smov 64   ;;  %s1895_s22 = smov 96   ;;  %s2339_s1 = inlined_call_operand.vmem [shape: f32[104,128], index: 1, kind: input, shape index: {}]   ;;  %s2340_s0 = inlined_call_operand.vmem [shape: f32[32,4], index: 0, kind: input, shape index: {}]   ;;  %s2341_s2 = inlined_call_operand.vmem [shape: f32[2,32], index: 2, kind: input, shape index: {}, may-alias: {2,4}]   ;;  %s2342_s4 = inlined_call_operand.vmem [shape: f32[2,32], index: 4, kind: output, shape index: {1}, may-alias: {2,4}]   ;;  %s2343_s3 = inlined_call_operand.vmem [shape: f32[32,4], index: 3, kind: output, shape index: {0}]  }
   0x1   :  { %v29_v0 = vld [vmem:[%s2339_s1 + $0x40] sm:$0xf]  ;;  %v58_v2 = vld [vmem:[%s2340_s0 + $0x8] sm:$0xff]  ;;  %v59_v5 = vld [vmem:[%s2340_s0 + $0x10] sm:$0xff]  ;;  %vm129_vm3 = vcmask 261120   ;;  %s1896_s23 = smov 32  }
   0x2   :  { %v57_v1 = vld [vmem:[%s2340_s0] sm:$0xff]  ;;  %v30_v3 = vpack.c.bf16 %v29_v0, %v29_v0  ;;  %v60_v6 = vld [vmem:[%s2340_s0 + $0x18] sm:$0xff]  ;;  %v24_v8 = vld [vmem:[%s2339_s1 + $0x28] sm:$0xff]  ;;  %vm269_vm4 = vcmask 254976  }
   0x3   :  { %v61_v4 = vpack.c.bf16 %v58_v2, %v57_v1  ;;  %v23_v7 = vld [vmem:[%s2339_s1 + $0x20] sm:$0xff]  ;;  %v62_v10 = vpack.c.bf16 %v60_v6, %v59_v5  ;;  %v25_v13 = vld [vmem:[%s2339_s1 + $0x30] sm:$0xff]  ;;  %v26_v14 = vld [vmem:[%s2339_s1 + $0x38] sm:$0xff] }
   0x4   :  { %1781 = vmatprep.subr.msk.bf16.mxu0 %vm70_vm0, %v30_v3  ;;  %v72_v9 = vsel %vm70_vm0, %v30_v3, 0  ;;  %v1944_v11 = vpack.c.bf16 %v24_v8, %v23_v7  ;;  %v1955_v15 = vpack.c.bf16 %v26_v14, %v25_v13  ;;  %v1962_v16 = vld [vmem:[%s2341_s2] sm:$0x3]  ;;  %v18_v19 = vld [vmem:[%s2339_s1 + $0x8] sm:$0xff]  ;;  %v19_v20 = vld [vmem:[%s2339_s1 + $0x10] sm:$0xff] }
   0x5   :  { %1633 = vmatprep.mubr.msk.bf16.mxu0 %vm63_vm1, %v61_v4  ;;  %1632 = vmatpush3.bf16.msra.mxu0 %v72_v9  ;;  %v191_v17 = vpack.c.bf16 %v1962_v16, %v1962_v16  ;;  %v17_v18 = vld [vmem:[%s2339_s1] sm:$0xff]  ;;  %v20_v22 = vld [vmem:[%s2339_s1 + $0x18] sm:$0xff] }
   0x6   :  { %1645 = vmatprep.subr.bf16.mxu0 %v1892_v12  ;;  %v21_v21 = vpack.c.bf16 %v18_v19, %v17_v18  ;;  %v22_v23 = vpack.c.bf16 %v20_v22, %v19_v20  ;;  %v1530_v24 = vld [vmem:[%s2339_s1 + $0x66] ss:$0 sm:$0xff]  ;;  %v1995_v33 = vld [vmem:[%s2339_s1 + $0x65] ss:$0 sm:$0xff]  ;;  %v1531_v45 = vld [vmem:[%s2339_s1 + $0x64] ss:$0 sm:$0xff] }
   0x8   :  { %1634 = vmatmul.mubr.msk.bf16.vlgmr.msra.gmra.mrb[0].mxu0 %vm63_vm1, %v62_v10  ;;  %1637 = vmatprep.subr.bf16.mxu1 %v21_v21 }
   0x9   :  { %1646 = vmatpush3.bf16.msra.mxu0 %v1944_v11  ;;  %1649 = vmatprep.mubr.msk.bf16.mxu0 %vm1893_vm2, %v1892_v12 }
   0xa   :  { %1647 = vmatprep.subr.bf16.mxu0 %v1892_v12  ;;  %1638 = vmatpush3.bf16.msra.mxu1 %v21_v21 }
   0xb   :  { %1639 = vmatprep.subr.bf16.mxu1 %v22_v23 }
   0xd   :  { %1648 = vmatpush3.bf16.msra.mxu0 %v1955_v15 }
   0xe   :  { %1661 = vmatprep.subr.bf16.mxu0 %v1892_v12  ;;  %1640 = vmatpush3.bf16.msra.mxu1 %v22_v23 }
   0xf   :  { %1653 = vmatprep.subr.bf16.mxu1 %v1892_v12 }
  0x10   :  { %1650 = vmatmul.mubr.msk.bf16.vlgmr.msra.gmra.mrb[4].mxu0 %vm129_vm3, %v191_v17 }
  0x11   :  { %1662 = vmatpush3.bf16.msra.mxu0 %v1944_v11  ;;  %1665 = vmatprep.mubr.msk.bf16.mxu0 %vm1893_vm2, %v1892_v12 }
  0x12   :  { %1663 = vmatprep.subr.bf16.mxu0 %v1892_v12 }
  0x15   :  { %1664 = vmatpush3.bf16.msra.mxu0 %v1955_v15 }
  0x16   :  { %1677 = vmatprep.subr.bf16.mxu0 %v1892_v12 }
  0xdb   :  { %v1635_v25 = vpop.f32.mrb[0].mxu0 }
  0xdc   :  { %v117_v26 = vadd.f32 %v1635_v25, %v1530_v24  ;;  %v108_v27 = vpop.f32.mrb[1].mxu0 }
  0xdd   :  { %v109_v28 = vadd.f32 %v1530_v24, %v108_v27  ;;  %v1636_v29 = vpop.f32.mrb[2].mxu0 }
  0xde   :  { %1787 = vtanh.f32 %v117_v26  ;;  %v120_v30 = vadd.f32 %v1636_v29, %v1530_v24  ;;  %v111_v31 = vpop.f32.mrb[3].mxu0 }
  0xdf   :  { %1789 = vtanh.f32 %v109_v28  ;;  %v112_v32 = vadd.f32 %v1530_v24, %v111_v31 }
  0xe0   :  { %1791 = vtanh.f32 %v120_v30 }
  0xe1   :  { %1793 = vtanh.f32 %v112_v32 }
  0xe3   :  { %v229_v34 = vpop.f32.mrb[4].mxu0 }
  0xe4   :  { %v230_v35 = vadd.f32 %v1995_v33, %v229_v34  ;;  %v1651_v36 = vpop.f32.mrb[5].mxu0 }
  0xe5   :  { %v232_v37 = vpop.f32.mrb[6].mxu0 }
  0xe6   :  { %v1652_v38 = vpop.f32.mrb[7].mxu0  ;;  %243 = vrot.lane.b32.xlu0 %v230_v35, %s1894_s19 }
  0xe8   :  { %v1788_v39 = vpop.eup %1787 }
  0xe9   :  { %v1790_v40 = vpop.eup %1789 }
  0xea   :  { %v1792_v41 = vpop.eup %1791 }
  0xeb   :  { %v1794_v42 = vpop.eup %1793  ;;  %v128_v43 = vpack.c.bf16 %v1792_v41, %v1788_v39 }
  0xec   :  { %v127_v44 = vpack.c.bf16 %v1794_v42, %v1790_v40 }
  0xee   :  { %1641 = vmatprep.mubr.msk.bf16.mxu1 %vm129_vm3, %v127_v44 }
  0xef   :  { %1642 = vmatmul.mubr.msk.bf16.vlgmr.msra.gmra.mrb[0].mxu1 %vm129_vm3, %v128_v43 }
  0xf0   :  { %1654 = vmatpush3.bf16.msra.mxu1 %v1944_v11  ;;  %1657 = vmatprep.mubr.msk.bf16.mxu1 %vm1893_vm2, %v1892_v12 }
  0xf1   :  { %1655 = vmatprep.subr.bf16.mxu1 %v1892_v12 }
  0xf4   :  { %1656 = vmatpush3.bf16.msra.mxu1 %v1955_v15 }
  0xf5   :  { %1669 = vmatprep.subr.bf16.mxu1 %v1892_v12 }
 0x158   :  { %v244_v59 = vpop.permute.xlu0 %243 }
 0x1c2   :  { %v1643_v46 = vpop.f32.mrb[0].mxu1 }
 0x1c3   :  { %v179_v47 = vadd.f32 %v1643_v46, %v1531_v45  ;;  %v170_v48 = vpop.f32.mrb[1].mxu1 }
 0x1c4   :  { %v171_v49 = vadd.f32 %v1531_v45, %v170_v48  ;;  %v1644_v50 = vpop.f32.mrb[2].mxu1 }
 0x1c5   :  { %187 = vst [vmem:[#allocation2 + $0x10] sm:$0xff] %v179_v47  ;;  %v182_v51 = vadd.f32 %v1644_v50, %v1531_v45  ;;  %v173_v52 = vpop.f32.mrb[3].mxu1 }
 0x1c6   :  { %185 = vst [vmem:[#allocation2] sm:$0xff] %v171_v49  ;;  %v174_v53 = vadd.f32 %v1531_v45, %v173_v52 }
 0x1c7   :  { %188 = vst [vmem:[#allocation2 + $0x18] sm:$0xff] %v182_v51 }
 0x1c8   :  { %186 = vst [vmem:[#allocation2 + $0x8] sm:$0xff] %v174_v53 }
 0x1cd   :  { %v190_v54 = vld [vmem:[#allocation2] sm:$0x3]  ;;  %v271_v17 = vld [vmem:[#allocation2 + $0x2] sm:$0x3]  ;;  %v350_v41 = vld [vmem:[#allocation2 + $0x4] sm:$0x3] }
 0x1ce   :  { %v235_v55 = vadd.f32 %v230_v35, %v190_v54 }
 0x1d0   :  { %v1539_v56 = vmul.f32 -1.442695, %v235_v55 }
 0x1d2   :  { %1795 = vpow2.f32 %v1539_v56 }
 0x1dc   :  { %v1796_v57 = vpop.eup %1795 }
 0x1dd   :  { %v239_v58 = vadd.f32 1.0, %v1796_v57 }
 0x1df   :  { %1797 = vrcp.f32 %v239_v58 }
 0x1e9   :  { %v1798_v60 = vpop.eup %1797 }
 0x1ea   :  { %v246_v61 = vmul.f32 %v1798_v60, %v244_v59  ;;  %v253_v2 = vsub.f32 1.0, %v1798_v60 }
 0x1ec   :  { %248 = vrot.lane.b32.xlu0 %v246_v61, %s1894_s19 }
 0x25e   :  { %v249_v62 = vpop.permute.xlu0 %248 }
 0x25f   :  { %v251_v63 = vadd.f32 %v249_v62, %v190_v54 }
 0x261   :  { %1799 = vtanh.f32 %v251_v63 }
 0x26b   :  { %v1800_v0 = vpop.eup %1799 }
 0x26c   :  { %255 = vrot.lane.b32.xlu1 %v1800_v0, %s1895_s22  ;;  %v429_v0 = vld [vmem:[#allocation2 + $0x6] sm:$0x3] }
 0x270   :  { %260 = vrot.lane.b32.xlu1 %v1962_v16, %s1896_s23 }
 0x2de   :  { %v256_v1 = vpop.permute.xlu1 %255 }
 0x2df   :  { %v258_v4 = vmul.f32 %v256_v1, %v253_v2 }
 0x2e2   :  { %v261_v3 = vpop.permute.xlu1 %260 }
 0x2e3   :  { %v263_v5 = vmul.f32 %v1798_v60, %v261_v3 }
 0x2e5   :  { %v2013_v6 = vadd.f32 %v263_v5, %v258_v4 }
 0x2e7   :  { %v272_v7 = vpack.c.bf16 %v2013_v6, %v2013_v6 }
 0x2e9   :  { %274 = vrot.lane.b32.xlu0 %v272_v7, %s1895_s22 }
 0x35b   :  { %v275_v8 = vpop.permute.xlu0 %274 }
 0x35c   :  { %1658 = vmatmul.mubr.msk.bf16.vlgmr.msra.gmra.mrb[4].mxu1 %vm129_vm3, %v275_v8 }
 0x35d   :  { %1670 = vmatpush3.bf16.msra.mxu1 %v1944_v11  ;;  %1673 = vmatprep.mubr.msk.bf16.mxu1 %vm1893_vm2, %v1892_v12 }
 0x35e   :  { %1671 = vmatprep.subr.bf16.mxu1 %v1892_v12 }
 0x361   :  { %1672 = vmatpush3.bf16.msra.mxu1 %v1955_v15 }
 0x362   :  { %1685 = vmatprep.subr.bf16.mxu1 %v1892_v12 }
 0x42f   :  { %v313_v9 = vpop.f32.mrb[4].mxu1 }
 0x430   :  { %v314_v10 = vadd.f32 %v1995_v33, %v313_v9  ;;  %v1659_v13 = vpop.f32.mrb[5].mxu1 }
 0x431   :  { %v316_v14 = vpop.f32.mrb[6].mxu1 }
 0x432   :  { %327 = vrot.lane.b32.xlu1 %v314_v10, %s1894_s19  ;;  %v1660_v16 = vpop.f32.mrb[7].mxu1  ;;  %v319_v18 = vadd.f32 %v314_v10, %v271_v17 }
 0x434   :  { %v1541_v19 = vmul.f32 -1.442695, %v319_v18 }
 0x436   :  { %1801 = vpow2.f32 %v1541_v19 }
 0x440   :  { %v1802_v20 = vpop.eup %1801 }
 0x441   :  { %v323_v21 = vadd.f32 1.0, %v1802_v20 }
 0x443   :  { %1803 = vrcp.f32 %v323_v21 }
 0x44d   :  { %v1804_v22 = vpop.eup %1803 }
 0x44e   :  { %v337_v28 = vsub.f32 1.0, %v1804_v22  ;;  %v343_v30 = vmul.f32 %v1804_v22, %v2013_v6 }
 0x4a4   :  { %v328_v23 = vpop.permute.xlu1 %327 }
 0x4a5   :  { %v330_v24 = vmul.f32 %v1804_v22, %v328_v23 }
 0x4a7   :  { %332 = vrot.lane.b32.xlu0 %v330_v24, %s1894_s19 }
 0x519   :  { %v333_v25 = vpop.permute.xlu0 %332 }
 0x51a   :  { %v335_v26 = vadd.f32 %v333_v25, %v271_v17 }
 0x51c   :  { %1805 = vtanh.f32 %v335_v26 }
 0x526   :  { %v1806_v27 = vpop.eup %1805 }
 0x527   :  { %339 = vrot.lane.b32.xlu1 %v1806_v27, %s1895_s22  ;;  %v508_v27 = vld [vmem:[#allocation2 + $0x8] sm:$0x3] }
 0x599   :  { %v340_v29 = vpop.permute.xlu1 %339 }
 0x59a   :  { %v342_v31 = vmul.f32 %v340_v29, %v337_v28 }
 0x59c   :  { %v2030_v32 = vadd.f32 %v343_v30, %v342_v31 }
 0x59e   :  { %v351_v34 = vpack.c.bf16 %v2030_v32, %v2030_v32 }
 0x5a0   :  { %353 = vrot.lane.b32.xlu0 %v351_v34, %s1895_s22 }
 0x612   :  { %v354_v35 = vpop.permute.xlu0 %353 }
 0x613   :  { %1666 = vmatmul.mubr.msk.bf16.vlgmr.msra.gmra.mrb[8].mxu0 %vm129_vm3, %v354_v35 }
 0x614   :  { %1678 = vmatpush3.bf16.msra.mxu0 %v1944_v11  ;;  %1681 = vmatprep.mubr.msk.bf16.mxu0 %vm1893_vm2, %v1892_v12 }
 0x615   :  { %1679 = vmatprep.subr.bf16.mxu0 %v1892_v12 }
 0x618   :  { %1680 = vmatpush3.bf16.msra.mxu0 %v1955_v15 }
 0x619   :  { %1693 = vmatprep.subr.bf16.mxu0 %v1892_v12 }
 0x6e6   :  { %v392_v36 = vpop.f32.mrb[8].mxu0 }
 0x6e7   :  { %v393_v37 = vadd.f32 %v1995_v33, %v392_v36  ;;  %v1667_v38 = vpop.f32.mrb[9].mxu0 }
 0x6e8   :  { %v395_v39 = vpop.f32.mrb[10].mxu0 }
 0x6e9   :  { %406 = vrot.lane.b32.xlu1 %v393_v37, %s1894_s19  ;;  %v1668_v40 = vpop.f32.mrb[11].mxu0  ;;  %v398_v42 = vadd.f32 %v393_v37, %v350_v41 }
 0x6eb   :  { %v1543_v43 = vmul.f32 -1.442695, %v398_v42 }
 0x6ed   :  { %1807 = vpow2.f32 %v1543_v43 }
 0x6f7   :  { %v1808_v44 = vpop.eup %1807 }
 0x6f8   :  { %v402_v45 = vadd.f32 1.0, %v1808_v44 }
 0x6fa   :  { %1809 = vrcp.f32 %v402_v45 }
 0x704   :  { %v1810_v46 = vpop.eup %1809 }
 0x705   :  { %v416_v52 = vsub.f32 1.0, %v1810_v46  ;;  %v422_v54 = vmul.f32 %v1810_v46, %v2030_v32 }
 0x75b   :  { %v407_v47 = vpop.permute.xlu1 %406 }
 0x75c   :  { %v409_v48 = vmul.f32 %v1810_v46, %v407_v47 }
 0x75e   :  { %411 = vrot.lane.b32.xlu0 %v409_v48, %s1894_s19 }
 0x7d0   :  { %v412_v49 = vpop.permute.xlu0 %411 }
 0x7d1   :  { %v414_v50 = vadd.f32 %v412_v49, %v350_v41 }
 0x7d3   :  { %1811 = vtanh.f32 %v414_v50 }
 0x7dd   :  { %v1812_v51 = vpop.eup %1811 }
 0x7de   :  { %418 = vrot.lane.b32.xlu1 %v1812_v51, %s1895_s22 }
 0x850   :  { %v419_v53 = vpop.permute.xlu1 %418 }
 0x851   :  { %v421_v55 = vmul.f32 %v419_v53, %v416_v52  ;;  %v587_v52 = vld [vmem:[#allocation2 + $0xa] sm:$0x3] }
 0x853   :  { %v2047_v56 = vadd.f32 %v422_v54, %v421_v55 }
 0x855   :  { %v430_v57 = vpack.c.bf16 %v2047_v56, %v2047_v56 }
 0x857   :  { %432 = vrot.lane.b32.xlu0 %v430_v57, %s1895_s22 }
 0x8c9   :  { %v433_v58 = vpop.permute.xlu0 %432 }
 0x8ca   :  { %1674 = vmatmul.mubr.msk.bf16.vlgmr.msra.gmra.mrb[8].mxu1 %vm129_vm3, %v433_v58 }
 0x8cb   :  { %1686 = vmatpush3.bf16.msra.mxu1 %v1944_v11  ;;  %1689 = vmatprep.mubr.msk.bf16.mxu1 %vm1893_vm2, %v1892_v12 }
 0x8cc   :  { %1687 = vmatprep.subr.bf16.mxu1 %v1892_v12 }
 0x8cf   :  { %1688 = vmatpush3.bf16.msra.mxu1 %v1955_v15 }
 0x8d0   :  { %1701 = vmatprep.subr.bf16.mxu1 %v1892_v12 }
 0x99d   :  { %v471_v59 = vpop.f32.mrb[8].mxu1 }
 0x99e   :  { %v472_v60 = vadd.f32 %v1995_v33, %v471_v59  ;;  %v1675_v61 = vpop.f32.mrb[9].mxu1 }
 0x99f   :  { %v474_v62 = vpop.f32.mrb[10].mxu1 }
 0x9a0   :  { %485 = vrot.lane.b32.xlu1 %v472_v60, %s1894_s19  ;;  %v1676_v63 = vpop.f32.mrb[11].mxu1  ;;  %v477_v1 = vadd.f32 %v472_v60, %v429_v0 }
 0x9a2   :  { %v1545_v2 = vmul.f32 -1.442695, %v477_v1 }
 0x9a4   :  { %1813 = vpow2.f32 %v1545_v2 }
 0x9ae   :  { %v1814_v3 = vpop.eup %1813 }
 0x9af   :  { %v481_v4 = vadd.f32 1.0, %v1814_v3 }
 0x9b1   :  { %1815 = vrcp.f32 %v481_v4 }
 0x9bb   :  { %v1816_v5 = vpop.eup %1815 }
 0x9bc   :  { %v495_v14 = vsub.f32 1.0, %v1816_v5  ;;  %v501_v17 = vmul.f32 %v1816_v5, %v2047_v56 }
 0xa12   :  { %v486_v7 = vpop.permute.xlu1 %485 }
 0xa13   :  { %v488_v8 = vmul.f32 %v1816_v5, %v486_v7 }
 0xa15   :  { %490 = vrot.lane.b32.xlu0 %v488_v8, %s1894_s19 }
 0xa87   :  { %v491_v9 = vpop.permute.xlu0 %490 }
 0xa88   :  { %v493_v10 = vadd.f32 %v491_v9, %v429_v0 }
 0xa8a   :  { %1817 = vtanh.f32 %v493_v10 }
 0xa94   :  { %v1818_v13 = vpop.eup %1817 }
 0xa95   :  { %497 = vrot.lane.b32.xlu1 %v1818_v13, %s1895_s22 }
 0xb07   :  { %v498_v16 = vpop.permute.xlu1 %497 }
 0xb08   :  { %v500_v18 = vmul.f32 %v498_v16, %v495_v14  ;;  %v666_v16 = vld [vmem:[#allocation2 + $0xc] sm:$0x3] }
 0xb0a   :  { %v2064_v19 = vadd.f32 %v501_v17, %v500_v18 }
 0xb0c   :  { %v509_v20 = vpack.c.bf16 %v2064_v19, %v2064_v19 }
 0xb0e   :  { %511 = vrot.lane.b32.xlu0 %v509_v20, %s1895_s22 }
 0xb80   :  { %v512_v21 = vpop.permute.xlu0 %511 }
 0xb81   :  { %1682 = vmatmul.mubr.msk.bf16.vlgmr.msra.gmra.mrb[12].mxu0 %vm129_vm3, %v512_v21 }
 0xb82   :  { %1694 = vmatpush3.bf16.msra.mxu0 %v1944_v11  ;;  %1697 = vmatprep.mubr.msk.bf16.mxu0 %vm1893_vm2, %v1892_v12 }
 0xb83   :  { %1695 = vmatprep.subr.bf16.mxu0 %v1892_v12 }
 0xb86   :  { %1696 = vmatpush3.bf16.msra.mxu0 %v1955_v15 }
 0xb87   :  { %1709 = vmatprep.subr.bf16.mxu0 %v1892_v12 }
 0xc54   :  { %v550_v22 = vpop.f32.mrb[12].mxu0 }
 0xc55   :  { %v551_v23 = vadd.f32 %v1995_v33, %v550_v22  ;;  %v1683_v24 = vpop.f32.mrb[13].mxu0 }
 0xc56   :  { %v553_v25 = vpop.f32.mrb[14].mxu0 }
 0xc57   :  { %564 = vrot.lane.b32.xlu1 %v551_v23, %s1894_s19  ;;  %v1684_v26 = vpop.f32.mrb[15].mxu0  ;;  %v556_v28 = vadd.f32 %v551_v23, %v508_v27 }
 0xc59   :  { %v1547_v29 = vmul.f32 -1.442695, %v556_v28 }
 0xc5b   :  { %1819 = vpow2.f32 %v1547_v29 }
 0xc65   :  { %v1820_v30 = vpop.eup %1819 }
 0xc66   :  { %v560_v31 = vadd.f32 1.0, %v1820_v30 }
 0xc68   :  { %1821 = vrcp.f32 %v560_v31 }
 0xc72   :  { %v1822_v34 = vpop.eup %1821 }
 0xc73   :  { %v574_v40 = vsub.f32 1.0, %v1822_v34  ;;  %v580_v42 = vmul.f32 %v1822_v34, %v2064_v19 }
 0xcc9   :  { %v565_v35 = vpop.permute.xlu1 %564 }
 0xcca   :  { %v567_v36 = vmul.f32 %v1822_v34, %v565_v35 }
 0xccc   :  { %569 = vrot.lane.b32.xlu0 %v567_v36, %s1894_s19 }
 0xd3e   :  { %v570_v37 = vpop.permute.xlu0 %569 }
 0xd3f   :  { %v572_v38 = vadd.f32 %v570_v37, %v508_v27 }
 0xd41   :  { %1823 = vtanh.f32 %v572_v38 }
 0xd4b   :  { %v1824_v39 = vpop.eup %1823 }
 0xd4c   :  { %576 = vrot.lane.b32.xlu1 %v1824_v39, %s1895_s22 }
 0xdbe   :  { %v577_v41 = vpop.permute.xlu1 %576 }
 0xdbf   :  { %v579_v43 = vmul.f32 %v577_v41, %v574_v40 }
 0xdc1   :  { %v2081_v44 = vadd.f32 %v580_v42, %v579_v43  ;;  %v745_v42 = vld [vmem:[#allocation2 + $0xe] sm:$0x3] }
 0xdc3   :  { %v588_v45 = vpack.c.bf16 %v2081_v44, %v2081_v44 }
 0xdc5   :  { %590 = vrot.lane.b32.xlu0 %v588_v45, %s1895_s22 }
 0xe37   :  { %v591_v46 = vpop.permute.xlu0 %590 }
 0xe38   :  { %1690 = vmatmul.mubr.msk.bf16.vlgmr.msra.gmra.mrb[12].mxu1 %vm129_vm3, %v591_v46 }
 0xe39   :  { %1702 = vmatpush3.bf16.msra.mxu1 %v1944_v11  ;;  %1705 = vmatprep.mubr.msk.bf16.mxu1 %vm1893_vm2, %v1892_v12 }
 0xe3a   :  { %1703 = vmatprep.subr.bf16.mxu1 %v1892_v12 }
 0xe3d   :  { %1704 = vmatpush3.bf16.msra.mxu1 %v1955_v15 }
 0xe3e   :  { %1717 = vmatprep.subr.bf16.mxu1 %v1892_v12 }
 0xf0b   :  { %v629_v47 = vpop.f32.mrb[12].mxu1 }
 0xf0c   :  { %v630_v48 = vadd.f32 %v1995_v33, %v629_v47  ;;  %v1691_v49 = vpop.f32.mrb[13].mxu1 }
 0xf0d   :  { %v632_v50 = vpop.f32.mrb[14].mxu1 }
 0xf0e   :  { %643 = vrot.lane.b32.xlu1 %v630_v48, %s1894_s19  ;;  %v1692_v51 = vpop.f32.mrb[15].mxu1  ;;  %v635_v53 = vadd.f32 %v630_v48, %v587_v52 }
 0xf10   :  { %v1549_v54 = vmul.f32 -1.442695, %v635_v53 }
 0xf12   :  { %1825 = vpow2.f32 %v1549_v54 }
 0xf1c   :  { %v1826_v55 = vpop.eup %1825 }
 0xf1d   :  { %v639_v57 = vadd.f32 1.0, %v1826_v55 }
 0xf1f   :  { %1827 = vrcp.f32 %v639_v57 }
 0xf29   :  { %v1828_v58 = vpop.eup %1827 }
 0xf2a   :  { %v653_v0 = vsub.f32 1.0, %v1828_v58  ;;  %v659_v2 = vmul.f32 %v1828_v58, %v2081_v44 }
 0xf80   :  { %v644_v59 = vpop.permute.xlu1 %643 }
 0xf81   :  { %v646_v60 = vmul.f32 %v1828_v58, %v644_v59 }
 0xf83   :  { %648 = vrot.lane.b32.xlu0 %v646_v60, %s1894_s19 }
 0xff5   :  { %v649_v61 = vpop.permute.xlu0 %648 }
 0xff6   :  { %v651_v62 = vadd.f32 %v649_v61, %v587_v52 }
 0xff8   :  { %1829 = vtanh.f32 %v651_v62 }
0x1002   :  { %v1830_v63 = vpop.eup %1829 }
0x1003   :  { %655 = vrot.lane.b32.xlu1 %v1830_v63, %s1895_s22 }
0x1075   :  { %v656_v1 = vpop.permute.xlu1 %655 }
0x1076   :  { %v658_v3 = vmul.f32 %v656_v1, %v653_v0 }
0x1078   :  { %v2098_v4 = vadd.f32 %v659_v2, %v658_v3  ;;  %v824_v3 = vld [vmem:[#allocation2 + $0x10] sm:$0x3] }
0x107a   :  { %v667_v5 = vpack.c.bf16 %v2098_v4, %v2098_v4 }
0x107c   :  { %669 = vrot.lane.b32.xlu0 %v667_v5, %s1895_s22 }
0x10ee   :  { %v670_v7 = vpop.permute.xlu0 %669 }
0x10ef   :  { %1698 = vmatmul.mubr.msk.bf16.vlgmr.msra.gmra.mrb[16].mxu0 %vm129_vm3, %v670_v7 }
0x10f0   :  { %1710 = vmatpush3.bf16.msra.mxu0 %v1944_v11  ;;  %1713 = vmatprep.mubr.msk.bf16.mxu0 %vm1893_vm2, %v1892_v12 }
0x10f1   :  { %1711 = vmatprep.subr.bf16.mxu0 %v1892_v12 }
0x10f4   :  { %1712 = vmatpush3.bf16.msra.mxu0 %v1955_v15 }
0x10f5   :  { %1725 = vmatprep.subr.bf16.mxu0 %v1892_v12 }
0x11c2   :  { %v708_v8 = vpop.f32.mrb[16].mxu0 }
0x11c3   :  { %v709_v9 = vadd.f32 %v1995_v33, %v708_v8  ;;  %v1699_v10 = vpop.f32.mrb[17].mxu0 }
0x11c4   :  { %v711_v13 = vpop.f32.mrb[18].mxu0 }
0x11c5   :  { %722 = vrot.lane.b32.xlu1 %v709_v9, %s1894_s19  ;;  %v1700_v14 = vpop.f32.mrb[19].mxu0  ;;  %v714_v17 = vadd.f32 %v709_v9, %v666_v16 }
0x11c7   :  { %v1551_v18 = vmul.f32 -1.442695, %v714_v17 }
0x11c9   :  { %1831 = vpow2.f32 %v1551_v18 }
0x11d3   :  { %v1832_v20 = vpop.eup %1831 }
0x11d4   :  { %v718_v21 = vadd.f32 1.0, %v1832_v20 }
0x11d6   :  { %1833 = vrcp.f32 %v718_v21 }
0x11e0   :  { %v1834_v22 = vpop.eup %1833 }
0x11e1   :  { %v732_v28 = vsub.f32 1.0, %v1834_v22  ;;  %v738_v30 = vmul.f32 %v1834_v22, %v2098_v4 }
0x1237   :  { %v723_v23 = vpop.permute.xlu1 %722 }
0x1238   :  { %v725_v24 = vmul.f32 %v1834_v22, %v723_v23 }
0x123a   :  { %727 = vrot.lane.b32.xlu0 %v725_v24, %s1894_s19 }
0x12ac   :  { %v728_v25 = vpop.permute.xlu0 %727 }
0x12ad   :  { %v730_v26 = vadd.f32 %v728_v25, %v666_v16 }
0x12af   :  { %1835 = vtanh.f32 %v730_v26 }
0x12b9   :  { %v1836_v27 = vpop.eup %1835 }
0x12ba   :  { %734 = vrot.lane.b32.xlu1 %v1836_v27, %s1895_s22 }
0x132c   :  { %v735_v29 = vpop.permute.xlu1 %734 }
0x132d   :  { %v737_v31 = vmul.f32 %v735_v29, %v732_v28 }
0x132f   :  { %v2115_v34 = vadd.f32 %v738_v30, %v737_v31 }
0x1331   :  { %v746_v35 = vpack.c.bf16 %v2115_v34, %v2115_v34 }
0x1333   :  { %748 = vrot.lane.b32.xlu0 %v746_v35, %s1895_s22  ;;  %v903_v35 = vld [vmem:[#allocation2 + $0x12] sm:$0x3] }
0x13a5   :  { %v749_v36 = vpop.permute.xlu0 %748 }
0x13a6   :  { %1706 = vmatmul.mubr.msk.bf16.vlgmr.msra.gmra.mrb[16].mxu1 %vm129_vm3, %v749_v36 }
0x13a7   :  { %1718 = vmatpush3.bf16.msra.mxu1 %v1944_v11  ;;  %1721 = vmatprep.mubr.msk.bf16.mxu1 %vm1893_vm2, %v1892_v12 }
0x13a8   :  { %1719 = vmatprep.subr.bf16.mxu1 %v1892_v12 }
0x13ab   :  { %1720 = vmatpush3.bf16.msra.mxu1 %v1955_v15 }
0x13ac   :  { %1733 = vmatprep.subr.bf16.mxu1 %v1892_v12 }
0x1479   :  { %v787_v37 = vpop.f32.mrb[16].mxu1 }
0x147a   :  { %v788_v38 = vadd.f32 %v1995_v33, %v787_v37  ;;  %v1707_v39 = vpop.f32.mrb[17].mxu1 }
0x147b   :  { %v790_v40 = vpop.f32.mrb[18].mxu1 }
0x147c   :  { %801 = vrot.lane.b32.xlu1 %v788_v38, %s1894_s19  ;;  %v1708_v41 = vpop.f32.mrb[19].mxu1  ;;  %v793_v43 = vadd.f32 %v788_v38, %v745_v42 }
0x147e   :  { %v1553_v45 = vmul.f32 -1.442695, %v793_v43 }
0x1480   :  { %1837 = vpow2.f32 %v1553_v45 }
0x148a   :  { %v1838_v46 = vpop.eup %1837 }
0x148b   :  { %v797_v47 = vadd.f32 1.0, %v1838_v46 }
0x148d   :  { %1839 = vrcp.f32 %v797_v47 }
0x1497   :  { %v1840_v48 = vpop.eup %1839 }
0x1498   :  { %v811_v54 = vsub.f32 1.0, %v1840_v48  ;;  %v817_v57 = vmul.f32 %v1840_v48, %v2115_v34 }
0x14ee   :  { %v802_v49 = vpop.permute.xlu1 %801 }
0x14ef   :  { %v804_v50 = vmul.f32 %v1840_v48, %v802_v49 }
0x14f1   :  { %806 = vrot.lane.b32.xlu0 %v804_v50, %s1894_s19 }
0x1563   :  { %v807_v51 = vpop.permute.xlu0 %806 }
0x1564   :  { %v809_v52 = vadd.f32 %v807_v51, %v745_v42 }
0x1566   :  { %1841 = vtanh.f32 %v809_v52 }
0x1570   :  { %v1842_v53 = vpop.eup %1841 }
0x1571   :  { %813 = vrot.lane.b32.xlu1 %v1842_v53, %s1895_s22 }
0x15e3   :  { %v814_v55 = vpop.permute.xlu1 %813 }
0x15e4   :  { %v816_v58 = vmul.f32 %v814_v55, %v811_v54 }
0x15e6   :  { %v2132_v59 = vadd.f32 %v817_v57, %v816_v58 }
0x15e8   :  { %v825_v60 = vpack.c.bf16 %v2132_v59, %v2132_v59 }
0x15ea   :  { %827 = vrot.lane.b32.xlu0 %v825_v60, %s1895_s22 }
0x165c   :  { %v828_v61 = vpop.permute.xlu0 %827 }
0x165d   :  { %1714 = vmatmul.mubr.msk.bf16.vlgmr.msra.gmra.mrb[20].mxu0 %vm129_vm3, %v828_v61  ;;  %v982_v61 = vld [vmem:[#allocation2 + $0x14] sm:$0x3] }
0x165e   :  { %1726 = vmatpush3.bf16.msra.mxu0 %v1944_v11  ;;  %1729 = vmatprep.mubr.msk.bf16.mxu0 %vm1893_vm2, %v1892_v12 }
0x165f   :  { %1727 = vmatprep.subr.bf16.mxu0 %v1892_v12 }
0x1662   :  { %1728 = vmatpush3.bf16.msra.mxu0 %v1955_v15 }
0x1663   :  { %1741 = vmatprep.subr.bf16.mxu0 %v1892_v12 }
0x1730   :  { %v866_v62 = vpop.f32.mrb[20].mxu0 }
0x1731   :  { %v867_v63 = vadd.f32 %v1995_v33, %v866_v62  ;;  %v1715_v0 = vpop.f32.mrb[21].mxu0 }
0x1732   :  { %v869_v1 = vpop.f32.mrb[22].mxu0 }
0x1733   :  { %880 = vrot.lane.b32.xlu1 %v867_v63, %s1894_s19  ;;  %v1716_v2 = vpop.f32.mrb[23].mxu0  ;;  %v872_v5 = vadd.f32 %v867_v63, %v824_v3 }
0x1735   :  { %v1555_v7 = vmul.f32 -1.442695, %v872_v5 }
0x1737   :  { %1843 = vpow2.f32 %v1555_v7 }
0x1741   :  { %v1844_v8 = vpop.eup %1843 }
0x1742   :  { %v876_v9 = vadd.f32 1.0, %v1844_v8 }
0x1744   :  { %1845 = vrcp.f32 %v876_v9 }
0x174e   :  { %v1846_v10 = vpop.eup %1845 }
0x174f   :  { %v890_v20 = vsub.f32 1.0, %v1846_v10  ;;  %v896_v22 = vmul.f32 %v1846_v10, %v2132_v59 }
0x17a5   :  { %v881_v13 = vpop.permute.xlu1 %880 }
0x17a6   :  { %v883_v14 = vmul.f32 %v1846_v10, %v881_v13 }
0x17a8   :  { %885 = vrot.lane.b32.xlu0 %v883_v14, %s1894_s19 }
0x181a   :  { %v886_v16 = vpop.permute.xlu0 %885 }
0x181b   :  { %v888_v17 = vadd.f32 %v886_v16, %v824_v3 }
0x181d   :  { %1847 = vtanh.f32 %v888_v17 }
0x1827   :  { %v1848_v18 = vpop.eup %1847 }
0x1828   :  { %892 = vrot.lane.b32.xlu1 %v1848_v18, %s1895_s22 }
0x189a   :  { %v893_v21 = vpop.permute.xlu1 %892 }
0x189b   :  { %v895_v23 = vmul.f32 %v893_v21, %v890_v20 }
0x189d   :  { %v2149_v24 = vadd.f32 %v896_v22, %v895_v23 }
0x189f   :  { %v904_v25 = vpack.c.bf16 %v2149_v24, %v2149_v24 }
0x18a1   :  { %906 = vrot.lane.b32.xlu0 %v904_v25, %s1895_s22 }
0x1913   :  { %v907_v26 = vpop.permute.xlu0 %906 }
0x1914   :  { %1722 = vmatmul.mubr.msk.bf16.vlgmr.msra.gmra.mrb[20].mxu1 %vm129_vm3, %v907_v26 }
0x1915   :  { %1734 = vmatpush3.bf16.msra.mxu1 %v1944_v11  ;;  %1737 = vmatprep.mubr.msk.bf16.mxu1 %vm1893_vm2, %v1892_v12 }
0x1916   :  { %1735 = vmatprep.subr.bf16.mxu1 %v1892_v12 }
0x1919   :  { %1736 = vmatpush3.bf16.msra.mxu1 %v1955_v15 }
0x191a   :  { %1749 = vmatprep.subr.bf16.mxu1 %v1892_v12 }
0x19e7   :  { %v945_v27 = vpop.f32.mrb[20].mxu1 }
0x19e8   :  { %v946_v28 = vadd.f32 %v1995_v33, %v945_v27  ;;  %v1723_v29 = vpop.f32.mrb[21].mxu1  ;;  %v1061_v27 = vld [vmem:[#allocation2 + $0x16] sm:$0x3] }
0x19e9   :  { %v948_v30 = vpop.f32.mrb[22].mxu1 }
0x19ea   :  { %959 = vrot.lane.b32.xlu1 %v946_v28, %s1894_s19  ;;  %v1724_v31 = vpop.f32.mrb[23].mxu1  ;;  %v951_v36 = vadd.f32 %v946_v28, %v903_v35 }
0x19ec   :  { %v1557_v37 = vmul.f32 -1.442695, %v951_v36 }
0x19ee   :  { %1849 = vpow2.f32 %v1557_v37 }
0x19f8   :  { %v1850_v38 = vpop.eup %1849 }
0x19f9   :  { %v955_v39 = vadd.f32 1.0, %v1850_v38 }
0x19fb   :  { %1851 = vrcp.f32 %v955_v39 }
0x1a05   :  { %v1852_v40 = vpop.eup %1851 }
0x1a06   :  { %v969_v47 = vsub.f32 1.0, %v1852_v40  ;;  %v975_v49 = vmul.f32 %v1852_v40, %v2149_v24 }
0x1a5c   :  { %v960_v41 = vpop.permute.xlu1 %959 }
0x1a5d   :  { %v962_v42 = vmul.f32 %v1852_v40, %v960_v41 }
0x1a5f   :  { %964 = vrot.lane.b32.xlu0 %v962_v42, %s1894_s19 }
0x1ad1   :  { %v965_v43 = vpop.permute.xlu0 %964 }
0x1ad2   :  { %v967_v45 = vadd.f32 %v965_v43, %v903_v35 }
0x1ad4   :  { %1853 = vtanh.f32 %v967_v45 }
0x1ade   :  { %v1854_v46 = vpop.eup %1853 }
0x1adf   :  { %971 = vrot.lane.b32.xlu1 %v1854_v46, %s1895_s22 }
0x1b51   :  { %v972_v48 = vpop.permute.xlu1 %971 }
0x1b52   :  { %v974_v50 = vmul.f32 %v972_v48, %v969_v47 }
0x1b54   :  { %v2166_v51 = vadd.f32 %v975_v49, %v974_v50 }
0x1b56   :  { %v983_v52 = vpack.c.bf16 %v2166_v51, %v2166_v51 }
0x1b58   :  { %985 = vrot.lane.b32.xlu0 %v983_v52, %s1895_s22 }
0x1bca   :  { %v986_v53 = vpop.permute.xlu0 %985 }
0x1bcb   :  { %1730 = vmatmul.mubr.msk.bf16.vlgmr.msra.gmra.mrb[24].mxu0 %vm129_vm3, %v986_v53 }
0x1bcc   :  { %1742 = vmatpush3.bf16.msra.mxu0 %v1944_v11  ;;  %1745 = vmatprep.mubr.msk.bf16.mxu0 %vm1893_vm2, %v1892_v12 }
0x1bcd   :  { %1743 = vmatprep.subr.bf16.mxu0 %v1892_v12 }
0x1bd0   :  { %1744 = vmatpush3.bf16.msra.mxu0 %v1955_v15 }
0x1bd1   :  { %1757 = vmatprep.subr.bf16.mxu0 %v1892_v12 }
0x1c9e   :  { %v1024_v54 = vpop.f32.mrb[24].mxu0 }
0x1c9f   :  { %v1025_v55 = vadd.f32 %v1995_v33, %v1024_v54  ;;  %v1731_v57 = vpop.f32.mrb[25].mxu0 }
0x1ca0   :  { %v1027_v58 = vpop.f32.mrb[26].mxu0 }
0x1ca1   :  { %1038 = vrot.lane.b32.xlu1 %v1025_v55, %s1894_s19  ;;  %v1732_v60 = vpop.f32.mrb[27].mxu0  ;;  %v1030_v62 = vadd.f32 %v1025_v55, %v982_v61  ;;  %v1140_v55 = vld [vmem:[#allocation2 + $0x18] sm:$0x3] }
0x1ca3   :  { %v1559_v63 = vmul.f32 -1.442695, %v1030_v62 }
0x1ca5   :  { %1855 = vpow2.f32 %v1559_v63 }
0x1caf   :  { %v1856_v0 = vpop.eup %1855 }
0x1cb0   :  { %v1034_v1 = vadd.f32 1.0, %v1856_v0 }
0x1cb2   :  { %1857 = vrcp.f32 %v1034_v1 }
0x1cbc   :  { %v1858_v2 = vpop.eup %1857 }
0x1cbd   :  { %v1048_v10 = vsub.f32 1.0, %v1858_v2  ;;  %v1054_v14 = vmul.f32 %v1858_v2, %v2166_v51 }
0x1d13   :  { %v1039_v3 = vpop.permute.xlu1 %1038 }
0x1d14   :  { %v1041_v5 = vmul.f32 %v1858_v2, %v1039_v3 }
0x1d16   :  { %1043 = vrot.lane.b32.xlu0 %v1041_v5, %s1894_s19 }
0x1d88   :  { %v1044_v7 = vpop.permute.xlu0 %1043 }
0x1d89   :  { %v1046_v8 = vadd.f32 %v1044_v7, %v982_v61 }
0x1d8b   :  { %1859 = vtanh.f32 %v1046_v8 }
0x1d95   :  { %v1860_v9 = vpop.eup %1859 }
0x1d96   :  { %1050 = vrot.lane.b32.xlu1 %v1860_v9, %s1895_s22 }
0x1e08   :  { %v1051_v13 = vpop.permute.xlu1 %1050 }
0x1e09   :  { %v1053_v16 = vmul.f32 %v1051_v13, %v1048_v10 }
0x1e0b   :  { %v2183_v17 = vadd.f32 %v1054_v14, %v1053_v16 }
0x1e0d   :  { %v1062_v18 = vpack.c.bf16 %v2183_v17, %v2183_v17 }
0x1e0f   :  { %1064 = vrot.lane.b32.xlu0 %v1062_v18, %s1895_s22 }
0x1e81   :  { %v1065_v20 = vpop.permute.xlu0 %1064 }
0x1e82   :  { %1738 = vmatmul.mubr.msk.bf16.vlgmr.msra.gmra.mrb[24].mxu1 %vm129_vm3, %v1065_v20 }
0x1e83   :  { %1750 = vmatpush3.bf16.msra.mxu1 %v1944_v11  ;;  %1753 = vmatprep.mubr.msk.bf16.mxu1 %vm1893_vm2, %v1892_v12 }
0x1e84   :  { %1751 = vmatprep.subr.bf16.mxu1 %v1892_v12 }
0x1e87   :  { %1752 = vmatpush3.bf16.msra.mxu1 %v1955_v15 }
0x1e88   :  { %1765 = vmatprep.subr.bf16.mxu1 %v1892_v12 }
0x1f55   :  { %v1103_v21 = vpop.f32.mrb[24].mxu1 }
0x1f56   :  { %v1104_v22 = vadd.f32 %v1995_v33, %v1103_v21  ;;  %v1739_v23 = vpop.f32.mrb[25].mxu1 }
0x1f57   :  { %v1106_v25 = vpop.f32.mrb[26].mxu1  ;;  %v1219_v23 = vld [vmem:[#allocation2 + $0x1a] sm:$0x3] }
0x1f58   :  { %1117 = vrot.lane.b32.xlu1 %v1104_v22, %s1894_s19  ;;  %v1740_v26 = vpop.f32.mrb[27].mxu1  ;;  %v1109_v28 = vadd.f32 %v1104_v22, %v1061_v27 }
0x1f5a   :  { %v1561_v29 = vmul.f32 -1.442695, %v1109_v28 }
0x1f5c   :  { %1861 = vpow2.f32 %v1561_v29 }
0x1f66   :  { %v1862_v30 = vpop.eup %1861 }
0x1f67   :  { %v1113_v31 = vadd.f32 1.0, %v1862_v30 }
0x1f69   :  { %1863 = vrcp.f32 %v1113_v31 }
0x1f73   :  { %v1864_v35 = vpop.eup %1863 }
0x1f74   :  { %v1127_v41 = vsub.f32 1.0, %v1864_v35  ;;  %v1133_v43 = vmul.f32 %v1864_v35, %v2183_v17 }
0x1fca   :  { %v1118_v36 = vpop.permute.xlu1 %1117 }
0x1fcb   :  { %v1120_v37 = vmul.f32 %v1864_v35, %v1118_v36 }
0x1fcd   :  { %1122 = vrot.lane.b32.xlu0 %v1120_v37, %s1894_s19 }
0x203f   :  { %v1123_v38 = vpop.permute.xlu0 %1122 }
0x2040   :  { %v1125_v39 = vadd.f32 %v1123_v38, %v1061_v27 }
0x2042   :  { %1865 = vtanh.f32 %v1125_v39 }
0x204c   :  { %v1866_v40 = vpop.eup %1865 }
0x204d   :  { %1129 = vrot.lane.b32.xlu1 %v1866_v40, %s1895_s22 }
0x20bf   :  { %v1130_v42 = vpop.permute.xlu1 %1129 }
0x20c0   :  { %v1132_v45 = vmul.f32 %v1130_v42, %v1127_v41  ;;  %v1891_v42 = vld [vmem:[%s2339_s1 + $0x65] ss:$0 sm:$0xff] }
0x20c2   :  { %v2200_v46 = vadd.f32 %v1133_v43, %v1132_v45 }
0x20c4   :  { %v1141_v47 = vpack.c.bf16 %v2200_v46, %v2200_v46 }
0x20c6   :  { %1143 = vrot.lane.b32.xlu0 %v1141_v47, %s1895_s22 }
0x2138   :  { %v1144_v48 = vpop.permute.xlu0 %1143 }
0x2139   :  { %1746 = vmatmul.mubr.msk.bf16.vlgmr.msra.gmra.mrb[28].mxu0 %vm129_vm3, %v1144_v48 }
0x213a   :  { %1758 = vmatpush3.bf16.msra.mxu0 %v1944_v11  ;;  %1761 = vmatprep.mubr.msk.bf16.mxu0 %vm1893_vm2, %v1892_v12 }
0x213b   :  { %1759 = vmatprep.subr.bf16.mxu0 %v1892_v12 }
0x213e   :  { %1760 = vmatpush3.bf16.msra.mxu0 %v1955_v15 }
0x220c   :  { %v1182_v49 = vpop.f32.mrb[28].mxu0 }
0x220d   :  { %v1183_v50 = vadd.f32 %v1995_v33, %v1182_v49  ;;  %v1747_v52 = vpop.f32.mrb[29].mxu0  ;;  %v1298_v49 = vld [vmem:[#allocation2 + $0x1c] sm:$0x3] }
0x220e   :  { %v1185_v53 = vpop.f32.mrb[30].mxu0 }
0x220f   :  { %1196 = vrot.lane.b32.xlu1 %v1183_v50, %s1894_s19  ;;  %v1748_v54 = vpop.f32.mrb[31].mxu0  ;;  %v1188_v57 = vadd.f32 %v1183_v50, %v1140_v55 }
0x2211   :  { %v1563_v58 = vmul.f32 -1.442695, %v1188_v57 }
0x2213   :  { %1867 = vpow2.f32 %v1563_v58 }
0x221d   :  { %v1868_v60 = vpop.eup %1867 }
0x221e   :  { %v1192_v61 = vadd.f32 1.0, %v1868_v60 }
0x2220   :  { %1869 = vrcp.f32 %v1192_v61 }
0x222a   :  { %v1870_v62 = vpop.eup %1869 }
0x222b   :  { %v1206_v5 = vsub.f32 1.0, %v1870_v62  ;;  %v1212_v8 = vmul.f32 %v1870_v62, %v2200_v46 }
0x2281   :  { %v1197_v63 = vpop.permute.xlu1 %1196 }
0x2282   :  { %v1199_v0 = vmul.f32 %v1870_v62, %v1197_v63 }
0x2284   :  { %1201 = vrot.lane.b32.xlu0 %v1199_v0, %s1894_s19 }
0x22f6   :  { %v1202_v1 = vpop.permute.xlu0 %1201 }
0x22f7   :  { %v1204_v2 = vadd.f32 %v1202_v1, %v1140_v55 }
0x22f9   :  { %1871 = vtanh.f32 %v1204_v2 }
0x2303   :  { %v1872_v3 = vpop.eup %1871 }
0x2304   :  { %1208 = vrot.lane.b32.xlu1 %v1872_v3, %s1895_s22 }
0x2376   :  { %v1209_v7 = vpop.permute.xlu1 %1208 }
0x2377   :  { %v1211_v9 = vmul.f32 %v1209_v7, %v1206_v5 }
0x2379   :  { %v2216_v10 = vadd.f32 %v1212_v8, %v1211_v9 }
0x237b   :  { %v1220_v13 = vpack.c.bf16 %v2216_v10, %v2216_v10 }
0x237d   :  { %1222 = vrot.lane.b32.xlu0 %v1220_v13, %s1895_s22 }
0x23ef   :  { %v1223_v14 = vpop.permute.xlu0 %1222 }
0x23f0   :  { %1754 = vmatmul.mubr.msk.bf16.vlgmr.msra.gmra.mrb[28].mxu1 %vm129_vm3, %v1223_v14 }
0x23f1   :  { %1766 = vmatpush3.bf16.msra.mxu1 %v1944_v11  ;;  %1769 = vmatprep.mubr.msk.bf16.mxu1 %vm1893_vm2, %v1892_v12 }
0x23f2   :  { %1767 = vmatprep.subr.bf16.mxu1 %v1892_v12 }
0x23f5   :  { %1768 = vmatpush3.bf16.msra.mxu1 %v1955_v15 }
0x24c3   :  { %v1261_v16 = vpop.f32.mrb[28].mxu1 }
0x24c4   :  { %v1262_v18 = vadd.f32 %v1995_v33, %v1261_v16  ;;  %v1755_v20 = vpop.f32.mrb[29].mxu1 }
0x24c5   :  { %v1264_v21 = vpop.f32.mrb[30].mxu1 }
0x24c6   :  { %1275 = vrot.lane.b32.xlu1 %v1262_v18, %s1894_s19  ;;  %v1756_v22 = vpop.f32.mrb[31].mxu1  ;;  %v1267_v25 = vadd.f32 %v1262_v18, %v1219_v23  ;;  %v1377_v18 = vld [vmem:[#allocation2 + $0x1e] sm:$0x3] }
0x24c8   :  { %v1565_v26 = vmul.f32 -1.442695, %v1267_v25 }
0x24ca   :  { %1873 = vpow2.f32 %v1565_v26 }
0x24d4   :  { %v1874_v11 = vpop.eup %1873 }
0x24d5   :  { %v1271_v27 = vadd.f32 1.0, %v1874_v11 }
0x24d7   :  { %1875 = vrcp.f32 %v1271_v27 }
0x24e1   :  { %v1876_v28 = vpop.eup %1875 }
0x24e2   :  { %v1285_v31 = vsub.f32 1.0, %v1876_v28  ;;  %v1291_v36 = vmul.f32 %v1876_v28, %v2216_v10 }
0x2538   :  { %v1276_v29 = vpop.permute.xlu1 %1275 }
0x2539   :  { %v1278_v12 = vmul.f32 %v1876_v28, %v1276_v29 }
0x253b   :  { %1280 = vrot.lane.b32.xlu0 %v1278_v12, %s1894_s19 }
0x25ad   :  { %v1281_v15 = vpop.permute.xlu0 %1280 }
0x25ae   :  { %v1283_v30 = vadd.f32 %v1281_v15, %v1219_v23 }
0x25b0   :  { %1877 = vtanh.f32 %v1283_v30 }
0x25ba   :  { %v1878_v33 = vpop.eup %1877 }
0x25bb   :  { %1287 = vrot.lane.b32.xlu1 %v1878_v33, %s1895_s22 }
0x262d   :  { %v1288_v35 = vpop.permute.xlu1 %1287 }
0x262e   :  { %v1290_v37 = vmul.f32 %v1288_v35, %v1285_v31 }
0x2630   :  { %v2232_v38 = vadd.f32 %v1291_v36, %v1290_v37 }
0x2632   :  { %v1299_v39 = vpack.c.bf16 %v2232_v38, %v2232_v38 }
0x2634   :  { %1301 = vrot.lane.b32.xlu0 %v1299_v39, %s1895_s22 }
0x26a6   :  { %v1302_v40 = vpop.permute.xlu0 %1301 }
0x26a7   :  { %1762 = vmatmul.mubr.msk.bf16.vlgmr.msra.gmra.mrb[32].mxu0 %vm129_vm3, %v1302_v40 }
0x277a   :  { %v1340_v41 = vpop.f32.mrb[32].mxu0 }
0x277b   :  { %v1341_v43 = vadd.f32 %v1891_v42, %v1340_v41  ;;  %v1763_v45 = vpop.f32.mrb[33].mxu0 }
0x277c   :  { %v1343_v47 = vpop.f32.mrb[34].mxu0 }
0x277d   :  { %1354 = vrot.lane.b32.xlu1 %v1341_v43, %s1894_s19  ;;  %v1764_v48 = vpop.f32.mrb[35].mxu0  ;;  %v1346_v50 = vadd.f32 %v1341_v43, %v1298_v49 }
0x277f   :  { %v1567_v52 = vmul.f32 -1.442695, %v1346_v50 }
0x2781   :  { %1879 = vpow2.f32 %v1567_v52 }
0x278b   :  { %v1880_v53 = vpop.eup %1879 }
0x278c   :  { %v1350_v54 = vadd.f32 1.0, %v1880_v53  ;;  %v1533_v53 = vld [vmem:[%s2339_s1 + $0x67] ss:$0 sm:$0xff] }
0x278e   :  { %1881 = vrcp.f32 %v1350_v54 }
0x2798   :  { %v1882_v55 = vpop.eup %1881 }
0x2799   :  { %v1364_v63 = vsub.f32 1.0, %v1882_v55  ;;  %v1370_v1 = vmul.f32 %v1882_v55, %v2232_v38 }
0x27ef   :  { %v1355_v57 = vpop.permute.xlu1 %1354 }
0x27f0   :  { %v1357_v58 = vmul.f32 %v1882_v55, %v1355_v57 }
0x27f2   :  { %1359 = vrot.lane.b32.xlu0 %v1357_v58, %s1894_s19 }
0x2864   :  { %v1360_v60 = vpop.permute.xlu0 %1359 }
0x2865   :  { %v1362_v61 = vadd.f32 %v1360_v60, %v1298_v49 }
0x2867   :  { %1883 = vtanh.f32 %v1362_v61 }
0x2871   :  { %v1884_v62 = vpop.eup %1883 }
0x2872   :  { %1366 = vrot.lane.b32.xlu1 %v1884_v62, %s1895_s22 }
0x28e4   :  { %v1367_v0 = vpop.permute.xlu1 %1366 }
0x28e5   :  { %v1369_v2 = vmul.f32 %v1367_v0, %v1364_v63 }
0x28e7   :  { %v2245_v3 = vadd.f32 %v1370_v1, %v1369_v2 }
0x28e9   :  { %v1378_v5 = vpack.c.bf16 %v2245_v3, %v2245_v3 }
0x28eb   :  { %1380 = vrot.lane.b32.xlu0 %v1378_v5, %s1895_s22 }
0x295d   :  { %v1381_v7 = vpop.permute.xlu0 %1380 }
0x295e   :  { %1770 = vmatmul.mubr.msk.bf16.vlgmr.msra.gmra.mrb[32].mxu1 %vm129_vm3, %v1381_v7 }
0x2a31   :  { %v1419_v8 = vpop.f32.mrb[32].mxu1 }
0x2a32   :  { %v1420_v9 = vadd.f32 %v1891_v42, %v1419_v8  ;;  %v1771_v13 = vpop.f32.mrb[33].mxu1 }
0x2a33   :  { %v1422_v14 = vpop.f32.mrb[34].mxu1 }
0x2a34   :  { %1433 = vrot.lane.b32.xlu1 %v1420_v9, %s1894_s19  ;;  %v1772_v16 = vpop.f32.mrb[35].mxu1  ;;  %v1425_v20 = vadd.f32 %v1420_v9, %v1377_v18 }
0x2a36   :  { %v1569_v21 = vmul.f32 -1.442695, %v1425_v20 }
0x2a38   :  { %1885 = vpow2.f32 %v1569_v21 }
0x2a42   :  { %v1886_v22 = vpop.eup %1885 }
0x2a43   :  { %v1429_v23 = vadd.f32 1.0, %v1886_v22 }
0x2a45   :  { %1887 = vrcp.f32 %v1429_v23 }
0x2a4f   :  { %v1888_v25 = vpop.eup %1887 }
0x2a50   :  { %v1443_v15 = vsub.f32 1.0, %v1888_v25  ;;  %v1449_v33 = vmul.f32 %v1888_v25, %v2245_v3 }
0x2aa6   :  { %v1434_v26 = vpop.permute.xlu1 %1433 }
0x2aa7   :  { %v1436_v11 = vmul.f32 %v1888_v25, %v1434_v26 }
0x2aa9   :  { %1438 = vrot.lane.b32.xlu0 %v1436_v11, %s1894_s19 }
0x2aad   :  { %266 = vrot.lane.b32.xlu0 %v2013_v6, %s1895_s22 }
0x2ab1   :  { %425 = vrot.lane.b32.xlu0 %v2047_v56, %s1895_s22 }
0x2ab5   :  { %583 = vrot.lane.b32.xlu0 %v2081_v44, %s1895_s22 }
0x2ab9   :  { %741 = vrot.lane.b32.xlu0 %v2115_v34, %s1895_s22 }
0x2abd   :  { %899 = vrot.lane.b32.xlu0 %v2149_v24, %s1895_s22 }
0x2ac1   :  { %1057 = vrot.lane.b32.xlu0 %v2183_v17, %s1895_s22 }
0x2ac5   :  { %1215 = vrot.lane.b32.xlu0 %v2216_v10, %s1895_s22 }
0x2ac9   :  { %1373 = vrot.lane.b32.xlu0 %v2245_v3, %s1895_s22 }
0x2b1b   :  { %v1439_v6 = vpop.permute.xlu0 %1438 }
0x2b1c   :  { %v1441_v56 = vadd.f32 %v1439_v6, %v1377_v18 }
0x2b1e   :  { %1889 = vtanh.f32 %v1441_v56 }
0x2b1f   :  { %v267_v44 = vpop.permute.xlu0 %266 }
0x2b20   :  { %270 = vst.msk [vmem:[#allocation3] sm:$0x3] %vm269_vm4, %v267_v44 }
0x2b23   :  { %v426_v34 = vpop.permute.xlu0 %425 }
0x2b24   :  { %428 = vst.msk [vmem:[#allocation3 + $0x4] sm:$0x3] %vm269_vm4, %v426_v34 }
0x2b27   :  { %v584_v24 = vpop.permute.xlu0 %583 }
0x2b28   :  { %v1890_v27 = vpop.eup %1889  ;;  %586 = vst.msk [vmem:[#allocation3 + $0x8] sm:$0x3] %vm269_vm4, %v584_v24 }
0x2b29   :  { %1445 = vrot.lane.b32.xlu1 %v1890_v27, %s1895_s22 }
0x2b2b   :  { %v742_v17 = vpop.permute.xlu0 %741 }
0x2b2c   :  { %744 = vst.msk [vmem:[#allocation3 + $0xc] sm:$0x3] %vm269_vm4, %v742_v17 }
0x2b2d   :  { %346 = vrot.lane.b32.xlu1 %v2030_v32, %s1895_s22  ;;  %v31_v32 = vld [vmem:[%s2339_s1 + $0x44] sm:$0xff] }
0x2b2f   :  { %v900_v10 = vpop.permute.xlu0 %899 }
0x2b30   :  { %902 = vst.msk [vmem:[#allocation3 + $0x10] sm:$0x3] %vm269_vm4, %v900_v10 }
0x2b31   :  { %504 = vrot.lane.b32.xlu1 %v2064_v19, %s1895_s22  ;;  %v32_v19 = vld [vmem:[%s2339_s1 + $0x4c] sm:$0xff] }
0x2b33   :  { %v1058_v28 = vpop.permute.xlu0 %1057 }
0x2b34   :  { %1060 = vst.msk [vmem:[#allocation3 + $0x14] sm:$0x3] %vm269_vm4, %v1058_v28 }
0x2b35   :  { %662 = vrot.lane.b32.xlu1 %v2098_v4, %s1895_s22  ;;  %v33_v4 = vld [vmem:[%s2339_s1 + $0x54] sm:$0xff] }
0x2b37   :  { %v1216_v29 = vpop.permute.xlu0 %1215 }
0x2b38   :  { %1218 = vst.msk [vmem:[#allocation3 + $0x18] sm:$0x3] %vm269_vm4, %v1216_v29 }
0x2b39   :  { %820 = vrot.lane.b32.xlu1 %v2132_v59, %s1895_s22  ;;  %v35_v59 = vpack.c.bf16 %v32_v19, %v31_v32 }
0x2b3b   :  { %v1374_v12 = vpop.permute.xlu0 %1373  ;;  %1773 = vmatprep.subr.bf16.mxu0 %v35_v59 }
0x2b3c   :  { %1376 = vst.msk [vmem:[#allocation3 + $0x1c] sm:$0x3] %vm269_vm4, %v1374_v12  ;;  %1774 = vmatpush3.bf16.msra.mxu0 %v35_v59 }
0x2b3d   :  { %978 = vrot.lane.b32.xlu1 %v2166_v51, %s1895_s22  ;;  %v34_v51 = vld [vmem:[%s2339_s1 + $0x5c] sm:$0xff] }
0x2b41   :  { %1136 = vrot.lane.b32.xlu1 %v2200_v46, %s1895_s22  ;;  %v36_v46 = vpack.c.bf16 %v34_v51, %v33_v4 }
0x2b43   :  { %1775 = vmatprep.subr.bf16.mxu0 %v36_v46 }
0x2b44   :  { %1776 = vmatpush3.bf16.msra.mxu0 %v36_v46 }
0x2b45   :  { %1294 = vrot.lane.b32.xlu1 %v2232_v38, %s1895_s22 }
0x2b9b   :  { %v1446_v30 = vpop.permute.xlu1 %1445 }
0x2b9c   :  { %v1448_v31 = vmul.f32 %v1446_v30, %v1443_v15 }
0x2b9e   :  { %v1450_v35 = vadd.f32 %v1449_v33, %v1448_v31 }
0x2b9f   :  { %v347_v36 = vpop.permute.xlu1 %346 }
0x2ba0   :  { %349 = vst.msk [vmem:[#allocation3 + $0x2] sm:$0x3] %vm269_vm4, %v347_v36  ;;  %1452 = vrot.lane.b32.xlu1 %v1450_v35, %s1895_s22 }
0x2ba3   :  { %v505_v37 = vpop.permute.xlu1 %504 }
0x2ba4   :  { %507 = vst.msk [vmem:[#allocation3 + $0x6] sm:$0x3] %vm269_vm4, %v505_v37 }
0x2ba7   :  { %v663_v38 = vpop.permute.xlu1 %662 }
0x2ba8   :  { %665 = vst.msk [vmem:[#allocation3 + $0xa] sm:$0x3] %vm269_vm4, %v663_v38 }
0x2bab   :  { %v821_v39 = vpop.permute.xlu1 %820  ;;  %v1457_v42 = vld [vmem:[#allocation3] sm:$0xff] }
0x2bac   :  { %823 = vst.msk [vmem:[#allocation3 + $0xe] sm:$0x3] %vm269_vm4, %v821_v39 }
0x2baf   :  { %v979_v40 = vpop.permute.xlu1 %978 }
0x2bb0   :  { %981 = vst.msk [vmem:[#allocation3 + $0x12] sm:$0x3] %vm269_vm4, %v979_v40 }
0x2bb3   :  { %v1137_v41 = vpop.permute.xlu1 %1136  ;;  %v1458_v43 = vld [vmem:[#allocation3 + $0x8] sm:$0xff] }
0x2bb4   :  { %1139 = vst.msk [vmem:[#allocation3 + $0x16] sm:$0x3] %vm269_vm4, %v1137_v41  ;;  %v1461_v45 = vpack.c.bf16 %v1458_v43, %v1457_v42 }
0x2bb6   :  { %1777 = vmatprep.mubr.msk.bf16.mxu0 %vm129_vm3, %v1461_v45 }
0x2bb7   :  { %v1295_v47 = vpop.permute.xlu1 %1294 }
0x2bb8   :  { %1297 = vst.msk [vmem:[#allocation3 + $0x1a] sm:$0x3] %vm269_vm4, %v1295_v47 }
0x2bbb   :  { %v1459_v49 = vld [vmem:[#allocation3 + $0x10] sm:$0xff] }
0x2c12   :  { %v1453_v48 = vpop.permute.xlu1 %1452 }
0x2c13   :  { %1455 = vst.msk [vmem:[#allocation3 + $0x1e] sm:$0x3] %vm269_vm4, %v1453_v48  ;;  %1456 = vst.msk [vmem:[%s2342_s4] sm:$0x3] %vm269_vm4, %v1453_v48 }
0x2c1a   :  { %v1460_v50 = vld [vmem:[#allocation3 + $0x18] sm:$0xff] }
0x2c1b   :  { %v1462_v52 = vpack.c.bf16 %v1460_v50, %v1459_v49 }
0x2c1d   :  { %1778 = vmatmul.mubr.msk.bf16.vlgmr.msra.gmra.mrb[36].mxu0 %vm129_vm3, %v1462_v52 }
0x2cf0   :  { %v1779_v54 = vpop.f32.mrb[36].mxu0 }
0x2cf1   :  { %v1512_v55 = vadd.f32 %v1779_v54, %v1533_v53  ;;  %v1503_v57 = vpop.f32.mrb[37].mxu0 }
0x2cf2   :  { %v1504_v58 = vadd.f32 %v1533_v53, %v1503_v57  ;;  %v1780_v60 = vpop.f32.mrb[38].mxu0 }
0x2cf3   :  { %1520 = vst.msk [vmem:[%s2343_s3 + $0x10] sm:$0xff] %vm63_vm1, %v1512_v55  ;;  %v1515_v61 = vadd.f32 %v1780_v60, %v1533_v53  ;;  %v1506_v62 = vpop.f32.mrb[39].mxu0 }
0x2cf4   :  { %1518 = vst.msk [vmem:[%s2343_s3] sm:$0xff] %vm63_vm1, %v1504_v58  ;;  %v1507_v63 = vadd.f32 %v1533_v53, %v1506_v62 }
0x2cf5   :  { %1521 = vst.msk [vmem:[%s2343_s3 + $0x18] sm:$0xff] %vm63_vm1, %v1515_v61 }
0x2cf6   :  { %1519 = vst.msk [vmem:[%s2343_s3 + $0x8] sm:$0xff] %vm63_vm1, %v1507_v63 }

</bundles_post_ra>
